<compile_context>
chip_gen: v7x
topology: tpu7x:2x2x1
jax: 0.10.0
libtpu: 0.0.40
codegen_flags: <defaults>
</compile_context>

<pallas_src>
import functools

import jax
import jax.numpy as jnp
from jax.experimental import pallas as pl
from jax.experimental.pallas import tpu as pltpu


def _sensory_kernel(g_ref, h_ref, w_ref, b_ref, o_ref, gh_ref, patch_ref, *,
                    Cv, Cs, H, W, mxu_dtype):
    """One grid step = one group of whole images folded onto the lane axis.

    g_ref:     (Cv, L)        value features, channel-major, f32
    h_ref:     (Cs, L)        previous sensory state, channel-major, f32
    w_ref:     (3*Cs, 9*Cin)  conv weight, im2col-flattened, mxu_dtype
    b_ref:     (3*Cs, 1)      conv bias, f32
    o_ref:     (Cs, L)        new sensory state, f32
    gh_ref:    (Cin, L)       VMEM scratch: concatenated [g; h], f32
    patch_ref: (9*Cin, L)     VMEM scratch: im2col patch, mxu_dtype
    """
    HW = H * W
    L = g_ref.shape[1]
    Cin = Cv + Cs

    # [g; h] slab once in VMEM (f32): every tap is a lane-roll of this buffer.
    gh_ref[:Cv, :] = g_ref[...]
    gh_ref[Cv:, :] = h_ref[...]

    # (1, L) boundary masks - broadcast over the channel sublanes inside jnp.where.
    # Row tests compare q % HW directly, so no integer divide is required.
    q = jax.lax.broadcasted_iota(jnp.int32, (1, L), 1)
    r = q % HW                        # flat position inside the image
    x = r % W                         # column inside the image
    x_ge1 = x >= 1                    # valid source when dx offset == -1
    x_lem = x <= W - 2                # valid source when dx offset == +1
    y_ge1 = r >= W                    # row >= 1   (dy offset == -1)
    y_lem = r < (H - 1) * W           # row <= H-2 (dy offset == +1)

    # im2col: tap (dy, dx) = lane-roll of [g; h] + boundary mask, stored straight
    # into the patch scratch.  Cross-image bleed and the circular wrap of the roll
    # only ever land on rows/cols the masks zero, matching 'same' zero padding.
    for dy in range(3):
        for dx in range(3):
            t = dy * 3 + dx
            delta = (dy - 1) * W + (dx - 1)       # flat-index shift of this tap
            tap = gh_ref[...]                     # (Cin, L) f32; per-tap reload
            if delta != 0:                        # keeps live vregs to ~one tap
                tap = pltpu.roll(tap, (-delta) % L, axis=1)
            mask = None
            for cond in ((y_ge1 if dy == 0 else y_lem if dy == 2 else None),
                         (x_ge1 if dx == 0 else x_lem if dx == 2 else None)):
                if cond is not None:
                    mask = cond if mask is None else mask & cond
            if mask is not None:
                tap = jnp.where(mask, tap, 0.0)
            patch_ref[t * Cin:(t + 1) * Cin, :] = tap.astype(mxu_dtype)

    # Single im2col matmul on the MXU, f32 accumulate, (Cout, L) orientation.
    values = jnp.dot(w_ref[...], patch_ref[...],
                     preferred_element_type=jnp.float32) + b_ref[...]     # (3*Cs, L)

    # GRU-style gated update (f32 elementwise, lane-dense output store).
    h = h_ref[...]
    forget_gate = jax.nn.sigmoid(values[:Cs])
    update_gate = jax.nn.sigmoid(values[Cs:2 * Cs])
    new_values = jnp.tanh(values[2 * Cs:])
    o_ref[...] = forget_gate * h * (1.0 - update_gate) + update_gate * new_values


def _default_num_blocks() -> int:
    """2 'parallel' blocks for dual-TensorCore v7x, 1 block for single-TC v5e/v6e."""
    try:
        kind = jax.devices()[0].device_kind.lower()
    except Exception:
        return 1
    return 2 if ("v7" in kind or "7x" in kind) else 1


def sensory_updater(g_BNCHW, h_BNCHW, weight_OIHW, bias_O, *,
                    mxu_dtype=jnp.bfloat16, num_blocks=None):
    """g: (B, N, Cv, H, W), h: (B, Nh, Cs, H, W)  ->  (B, N, Cs, H, W)."""
    B, N, Cv, H, W = g_BNCHW.shape
    Bh, Nh, Cs, Hh, Wh = h_BNCHW.shape
    assert (Bh, Hh, Wh) == (B, H, W)
    assert Nh in (1, N), "h object axis must be 1 (broadcast) or equal g's N"
    Cin = Cv + Cs
    Cout = 3 * Cs
    HW = H * W
    D = B * N                               # total images
    L_total = D * HW

    # Aligned sublane stores into the mxu_dtype patch need Cin to be a multiple of
    # the packed sublane tile (16 for bf16, 8 for f32).
    sub = 16 if jnp.dtype(mxu_dtype).itemsize == 2 else 8
    assert Cin % sub == 0, f"Cv + Cs = {Cin} must be a multiple of {sub} for {mxu_dtype}"
    # TODO(synk): pad H*W up to a 128 multiple in the wrapper for production spatial
    # sizes that are not (keeps output stores unmasked full-lane vst).

    # Channel-major slabs: one tiny one-time XLA transpose (fused with the Nh==1
    # broadcast); everything else is a free trailing-dim reshape.
    g_cm = jnp.transpose(g_BNCHW.reshape(B, N, Cv, HW), (2, 0, 1, 3)).reshape(Cv, L_total)
    h5 = h_BNCHW.reshape(B, Nh, Cs, HW)
    if Nh != N:
        h5 = jnp.broadcast_to(h5, (B, N, Cs, HW))
    h_cm = jnp.transpose(h5, (2, 0, 1, 3)).reshape(Cs, L_total)

    # PyTorch (Cout, Cin, 3, 3) -> im2col-flattened (Cout, 9*Cin); the K ordering
    # (dy, dx, ci) matches the patch built inside the kernel.
    w2 = jnp.transpose(weight_OIHW, (0, 2, 3, 1)).reshape(Cout, 9 * Cin).astype(mxu_dtype)
    b2 = bias_O.reshape(Cout, 1).astype(jnp.float32)

    # Grid: split whole images across blocks (the roll+mask halo is per-image, so any
    # whole-image grouping is valid); block lane width must stay a 128 multiple.
    if num_blocks is None:
        num_blocks = _default_num_blocks()
    num_blocks = max(1, min(int(num_blocks), D))
    while num_blocks > 1 and (D % num_blocks != 0
                              or ((D // num_blocks) * HW) % 128 != 0):
        num_blocks -= 1
    L_blk = (D // num_blocks) * HW

    # VMEM scaling guard (v7x: 64 MiB per TensorCore, keep double-buffer headroom).
    f32b, mxub = 4, jnp.dtype(mxu_dtype).itemsize
    vmem_est = (L_blk * (2 * (Cv + Cs) * f32b    # double-buffered f32 input blocks
                         + 2 * Cs * f32b         # double-buffered f32 output block
                         + Cin * f32b            # [g; h] scratch
                         + 9 * Cin * mxub        # im2col patch scratch
                         + 3 * Cs * f32b         # conv values / gate temporaries
                         + Cin * f32b)           # roll / select temporaries
                + Cout * (9 * Cin + 1) * (mxub + f32b))
    if vmem_est > 48 * 2 ** 20:
        raise ValueError(
            f"per-block VMEM estimate {vmem_est / 2**20:.1f} MiB is too large for "
            "v7x; call with a larger num_blocks (whole images per block, no halo).")
    compiler_kwargs = {}
    if vmem_est > 14 * 2 ** 20:  # above the smallest default scoped-VMEM limit (v5e)
        compiler_kwargs["vmem_limit_bytes"] = int(min(vmem_est + (8 << 20), 64 << 20))

    kernel = functools.partial(_sensory_kernel, Cv=Cv, Cs=Cs, H=H, W=W,
                               mxu_dtype=mxu_dtype)

    out_cm = pl.pallas_call(
        kernel,
        out_shape=jax.ShapeDtypeStruct((Cs, L_total), jnp.float32),
        grid_spec=pltpu.PrefetchScalarGridSpec(
            num_scalar_prefetch=0,
            grid=(num_blocks,),
            in_specs=[
                pl.BlockSpec((Cv, L_blk), lambda i: (0, i)),
                pl.BlockSpec((Cs, L_blk), lambda i: (0, i)),
                pl.BlockSpec((Cout, 9 * Cin), lambda i: (0, 0)),  # VMEM-resident
                pl.BlockSpec((Cout, 1), lambda i: (0, 0)),        # VMEM-resident
            ],
            out_specs=pl.BlockSpec((Cs, L_blk), lambda i: (0, i)),
            scratch_shapes=[
                pltpu.VMEM((Cin, L_blk), jnp.float32),        # [g; h] slab
                pltpu.VMEM((9 * Cin, L_blk), mxu_dtype),      # im2col patch
            ],
        ),
        compiler_params=pltpu.CompilerParams(
            dimension_semantics=("parallel",), **compiler_kwargs),
    )(g_cm, h_cm, w2, b2)

    # Back to the PyTorch layout (tiny one-time XLA transpose).
    return (out_cm.reshape(Cs, B, N, HW).transpose(1, 2, 0, 3)
            .reshape(B, N, Cs, H, W))


def _reference(g_BNCHW, h_BNCHW, weight_OIHW, bias_O):
    """Pure-JAX (XLA) reference matching the PyTorch module, all in f32."""
    B, N, Cv, H, W = g_BNCHW.shape
    _, Nh, Cs, _, _ = h_BNCHW.shape
    if Nh == 1 and Nh < N:
        h_BNCHW = jnp.broadcast_to(h_BNCHW, (B, N, Cs, H, W))
    gh = jnp.concatenate([g_BNCHW, h_BNCHW], axis=2).reshape(B * N, Cv + Cs, H, W)
    v = jax.lax.conv_general_dilated(
        gh, weight_OIHW, window_strides=(1, 1), padding=((1, 1), (1, 1)),
        dimension_numbers=("NCHW", "OIHW", "NCHW"))
    v = v + bias_O[None, :, None, None]
    v = v.reshape(B, N, 3 * Cs, H, W)
    f = jax.nn.sigmoid(v[:, :, :Cs])
    u = jax.nn.sigmoid(v[:, :, Cs:2 * Cs])
    n = jnp.tanh(v[:, :, 2 * Cs:])
    return f * h_BNCHW * (1.0 - u) + u * n


if __name__ == "__main__":
    key = jax.random.PRNGKey(0)
    k_g, k_h, k_w, k_b, k_h2 = jax.random.split(key, 5)

    B, N = 2, 2
    value_dim, sensory_dim = 8, 8
    H = W = 16
    Cin = value_dim + sensory_dim
    Cout = sensory_dim * 3

    # Inputs (PyTorch NCHW convention with leading (B, N)).
    g = jax.random.normal(k_g, (B, N, value_dim, H, W), jnp.float32)
    h = jax.random.normal(k_h, (B, 1, sensory_dim, H, W), jnp.float32)  # Nh=1 -> expand

    # Conv params: xavier_normal_ weight, PyTorch-default-style uniform bias.
    fan_in, fan_out = Cin * 9, Cout * 9
    xavier_std = (2.0 / (fan_in + fan_out)) ** 0.5
    weight = xavier_std * jax.random.normal(k_w, (Cout, Cin, 3, 3), jnp.float32)
    bound = 1.0 / (fan_in ** 0.5)
    bias = jax.random.uniform(k_b, (Cout,), jnp.float32, -bound, bound)

    ref = jax.block_until_ready(_reference(g, h, weight, bias))

    # 1) f32 MXU operands, single-block grid (v5e/v6e fold): tight check.
    out_f32 = jax.block_until_ready(
        sensory_updater(g, h, weight, bias, mxu_dtype=jnp.float32, num_blocks=1))
    assert out_f32.shape == (B, N, sensory_dim, H, W)
    assert jnp.allclose(out_f32, ref, atol=1e-5, rtol=1e-5), \
        float(jnp.abs(out_f32 - ref).max())

    # 2) f32, two "parallel" blocks (dual-TensorCore v7x path): tight check.
    out_2blk = jax.block_until_ready(
        sensory_updater(g, h, weight, bias, mxu_dtype=jnp.float32, num_blocks=2))
    assert jnp.allclose(out_2blk, ref, atol=1e-5, rtol=1e-5), \
        float(jnp.abs(out_2blk - ref).max())

    # 3) Nh == N path (no broadcast), f32, tight check.
    h_full = jax.random.normal(k_h2, (B, N, sensory_dim, H, W), jnp.float32)
    ref_full = jax.block_until_ready(_reference(g, h_full, weight, bias))
    out_full = jax.block_until_ready(
        sensory_updater(g, h_full, weight, bias, mxu_dtype=jnp.float32))
    assert jnp.allclose(out_full, ref_full, atol=1e-5, rtol=1e-5), \
        float(jnp.abs(out_full - ref_full).max())

    # 4) Default fast path: bf16 MXU operands (f32 accumulate + f32 gate math),
    #    chip-dependent default grid; tolerance set to bf16-operand accuracy.
    out_bf16 = jax.block_until_ready(sensory_updater(g, h, weight, bias))
    assert out_bf16.shape == (B, N, sensory_dim, H, W)
    assert jnp.allclose(out_bf16, ref, atol=3e-2, rtol=3e-2), \
        float(jnp.abs(out_bf16 - ref).max())

    print("KERNEL_OK")
</pallas_src>

<mosaic_0001>
module attributes {stable_mosaic.version = 11 : i64} {
  func.func @_sensory_kernel(%arg0: i32, %arg1: memref<8x1024xf32, #tpu.memory_space<vmem>>, %arg2: memref<8x1024xf32, #tpu.memory_space<vmem>>, %arg3: memref<24x144xf32, #tpu.memory_space<vmem>>, %arg4: memref<24x1xf32, #tpu.memory_space<vmem>>, %arg5: memref<8x1024xf32, #tpu.memory_space<vmem>>, %arg6: memref<16x1024xf32, #tpu.memory_space<vmem>>, %arg7: memref<144x1024xf32, #tpu.memory_space<vmem>>) attributes {dimension_semantics = [#tpu.dimension_semantics<parallel>], iteration_bounds = array<i64: 1>, scalar_prefetch = 0 : i64, scratch_operands = 2 : i64, tpu.core_type = #tpu.core_type<tc>, window_params = [{transform_indices = @transform_0, window_bounds = array<i64: 8, 1024>}, {transform_indices = @transform_1, window_bounds = array<i64: 8, 1024>}, {pipeline_mode = #tpu.pipeline_mode<synchronous>, transform_indices = @transform_2, window_bounds = array<i64: 24, 144>}, {pipeline_mode = #tpu.pipeline_mode<synchronous>, transform_indices = @transform_3, window_bounds = array<i64: 24, 1>}, {transform_indices = @transform_4, window_bounds = array<i64: 8, 1024>}]} {
    %c0 = arith.constant 0 : index
    %c0_0 = arith.constant 0 : index
    %0 = vector.load %arg1[%c0, %c0_0] : memref<8x1024xf32, #tpu.memory_space<vmem>>, vector<8x1024xf32>
    %c0_1 = arith.constant 0 : index
    %c0_2 = arith.constant 0 : index
    %1 = vector.load %arg6[%c0_1, %c0_2] : memref<16x1024xf32, #tpu.memory_space<vmem>>, vector<8x1024xf32>
    tpu.vector_store %arg6[%c0_1, %c0_2], %0 {strides = array<i32>} : memref<16x1024xf32, #tpu.memory_space<vmem>>, vector<8x1024xf32>,
    %c0_3 = arith.constant 0 : index
    %c0_4 = arith.constant 0 : index
    %2 = vector.load %arg2[%c0_3, %c0_4] : memref<8x1024xf32, #tpu.memory_space<vmem>>, vector<8x1024xf32>
    %c8 = arith.constant 8 : index
    %c0_5 = arith.constant 0 : index
    %3 = vector.load %arg6[%c8, %c0_5] : memref<16x1024xf32, #tpu.memory_space<vmem>>, vector<8x1024xf32>
    tpu.vector_store %arg6[%c8, %c0_5], %2 {strides = array<i32>} : memref<16x1024xf32, #tpu.memory_space<vmem>>, vector<8x1024xf32>,
    %4 = tpu.iota {dimensions = array<i32: 1>} : vector<1x1024xi32>
    %c256_i32 = arith.constant 256 : i32
    %c0_i32 = arith.constant 0 : i32
    %5 = arith.cmpi eq, %c256_i32, %c0_i32 : i32
    %c1_i32 = arith.constant 1 : i32
    %6 = arith.select %5, %c1_i32, %c256_i32 : i32
    %7 = vector.broadcast %6 : i32 to vector<1x1024xi32>
    %8 = arith.remsi %4, %7 : vector<1x1024xi32>
    %c0_i32_6 = arith.constant 0 : i32
    %9 = vector.broadcast %c0_i32_6 : i32 to vector<1x1024xi32>
    %10 = arith.cmpi ne, %8, %9 : vector<1x1024xi32>
    %c0_i32_7 = arith.constant 0 : i32
    %11 = vector.broadcast %c0_i32_7 : i32 to vector<1x1024xi32>
    %12 = arith.cmpi slt, %8, %11 : vector<1x1024xi32>
    %c0_i32_8 = arith.constant 0 : i32
    %13 = arith.cmpi slt, %6, %c0_i32_8 : i32
    %14 = vector.broadcast %13 : i1 to vector<1x1024xi1>
    %15 = vector.broadcast %14 : vector<1x1024xi1> to vector<1x1024xi1>
    %16 = arith.xori %12, %15 : vector<1x1024xi1>
    %17 = arith.andi %16, %10 : vector<1x1024xi1>
    %18 = vector.broadcast %6 : i32 to vector<1x1024xi32>
    %19 = arith.addi %8, %18 : vector<1x1024xi32>
    %20 = arith.select %17, %19, %8 : vector<1x1024xi1>, vector<1x1024xi32>
    %c16_i32 = arith.constant 16 : i32
    %c0_i32_9 = arith.constant 0 : i32
    %21 = arith.cmpi eq, %c16_i32, %c0_i32_9 : i32
    %c1_i32_10 = arith.constant 1 : i32
    %22 = arith.select %21, %c1_i32_10, %c16_i32 : i32
    %23 = vector.broadcast %22 : i32 to vector<1x1024xi32>
    %24 = arith.remsi %20, %23 : vector<1x1024xi32>
    %c0_i32_11 = arith.constant 0 : i32
    %25 = vector.broadcast %c0_i32_11 : i32 to vector<1x1024xi32>
    %26 = arith.cmpi ne, %24, %25 : vector<1x1024xi32>
    %c0_i32_12 = arith.constant 0 : i32
    %27 = vector.broadcast %c0_i32_12 : i32 to vector<1x1024xi32>
    %28 = arith.cmpi slt, %24, %27 : vector<1x1024xi32>
    %c0_i32_13 = arith.constant 0 : i32
    %29 = arith.cmpi slt, %22, %c0_i32_13 : i32
    %30 = vector.broadcast %29 : i1 to vector<1x1024xi1>
    %31 = vector.broadcast %30 : vector<1x1024xi1> to vector<1x1024xi1>
    %32 = arith.xori %28, %31 : vector<1x1024xi1>
    %33 = arith.andi %32, %26 : vector<1x1024xi1>
    %34 = vector.broadcast %22 : i32 to vector<1x1024xi32>
    %35 = arith.addi %24, %34 : vector<1x1024xi32>
    %36 = arith.select %33, %35, %24 : vector<1x1024xi1>, vector<1x1024xi32>
    %c1_i32_14 = arith.constant 1 : i32
    %37 = vector.broadcast %c1_i32_14 : i32 to vector<1x1024xi32>
    %38 = arith.cmpi sge, %36, %37 : vector<1x1024xi32>
    %c14_i32 = arith.constant 14 : i32
    %39 = vector.broadcast %c14_i32 : i32 to vector<1x1024xi32>
    %40 = arith.cmpi sle, %36, %39 : vector<1x1024xi32>
    %c16_i32_15 = arith.constant 16 : i32
    %41 = vector.broadcast %c16_i32_15 : i32 to vector<1x1024xi32>
    %42 = arith.cmpi sge, %20, %41 : vector<1x1024xi32>
    %c240_i32 = arith.constant 240 : i32
    %43 = vector.broadcast %c240_i32 : i32 to vector<1x1024xi32>
    %44 = arith.cmpi slt, %20, %43 : vector<1x1024xi32>
    %c0_16 = arith.constant 0 : index
    %c0_17 = arith.constant 0 : index
    %45 = vector.load %arg6[%c0_16, %c0_17] : memref<16x1024xf32, #tpu.memory_space<vmem>>, vector<16x1024xf32>
    %c17_i32 = arith.constant 17 : i32
    %46 = tpu.dynamic_rotate %45 by %c17_i32 dim 1 : vector<16x1024xf32>, i32 -> vector<16x1024xf32>
    %47 = arith.andi %42, %38 : vector<1x1024xi1>
    %cst = arith.constant 0.000000e+00 : f32
    %48 = vector.shape_cast %47 : vector<1x1024xi1> to vector<1x1024xi1>
    %49 = vector.broadcast %48 : vector<1x1024xi1> to vector<16x1024xi1>
    %50 = vector.broadcast %cst : f32 to vector<16x1024xf32>
    %51 = arith.select %49, %46, %50 : vector<16x1024xi1>, vector<16x1024xf32>
    %c0_18 = arith.constant 0 : index
    %c0_19 = arith.constant 0 : index
    %52 = vector.load %arg7[%c0_18, %c0_19] : memref<144x1024xf32, #tpu.memory_space<vmem>>, vector<16x1024xf32>
    tpu.vector_store %arg7[%c0_18, %c0_19], %51 {strides = array<i32>} : memref<144x1024xf32, #tpu.memory_space<vmem>>, vector<16x1024xf32>,
    %c0_20 = arith.constant 0 : index
    %c0_21 = arith.constant 0 : index
    %53 = vector.load %arg6[%c0_20, %c0_21] : memref<16x1024xf32, #tpu.memory_space<vmem>>, vector<16x1024xf32>
    %c16_i32_22 = arith.constant 16 : i32
    %54 = tpu.dynamic_rotate %53 by %c16_i32_22 dim 1 : vector<16x1024xf32>, i32 -> vector<16x1024xf32>
    %cst_23 = arith.constant 0.000000e+00 : f32
    %55 = vector.shape_cast %42 : vector<1x1024xi1> to vector<1x1024xi1>
    %56 = vector.broadcast %55 : vector<1x1024xi1> to vector<16x1024xi1>
    %57 = vector.broadcast %cst_23 : f32 to vector<16x1024xf32>
    %58 = arith.select %56, %54, %57 : vector<16x1024xi1>, vector<16x1024xf32>
    %c16 = arith.constant 16 : index
    %c0_24 = arith.constant 0 : index
    %59 = vector.load %arg7[%c16, %c0_24] : memref<144x1024xf32, #tpu.memory_space<vmem>>, vector<16x1024xf32>
    tpu.vector_store %arg7[%c16, %c0_24], %58 {strides = array<i32>} : memref<144x1024xf32, #tpu.memory_space<vmem>>, vector<16x1024xf32>,
    %c0_25 = arith.constant 0 : index
    %c0_26 = arith.constant 0 : index
    %60 = vector.load %arg6[%c0_25, %c0_26] : memref<16x1024xf32, #tpu.memory_space<vmem>>, vector<16x1024xf32>
    %c15_i32 = arith.constant 15 : i32
    %61 = tpu.dynamic_rotate %60 by %c15_i32 dim 1 : vector<16x1024xf32>, i32 -> vector<16x1024xf32>
    %62 = arith.andi %42, %40 : vector<1x1024xi1>
    %cst_27 = arith.constant 0.000000e+00 : f32
    %63 = vector.shape_cast %62 : vector<1x1024xi1> to vector<1x1024xi1>
    %64 = vector.broadcast %63 : vector<1x1024xi1> to vector<16x1024xi1>
    %65 = vector.broadcast %cst_27 : f32 to vector<16x1024xf32>
    %66 = arith.select %64, %61, %65 : vector<16x1024xi1>, vector<16x1024xf32>
    %c32 = arith.constant 32 : index
    %c0_28 = arith.constant 0 : index
    %67 = vector.load %arg7[%c32, %c0_28] : memref<144x1024xf32, #tpu.memory_space<vmem>>, vector<16x1024xf32>
    tpu.vector_store %arg7[%c32, %c0_28], %66 {strides = array<i32>} : memref<144x1024xf32, #tpu.memory_space<vmem>>, vector<16x1024xf32>,
    %c0_29 = arith.constant 0 : index
    %c0_30 = arith.constant 0 : index
    %68 = vector.load %arg6[%c0_29, %c0_30] : memref<16x1024xf32, #tpu.memory_space<vmem>>, vector<16x1024xf32>
    %c1_i32_31 = arith.constant 1 : i32
    %69 = tpu.dynamic_rotate %68 by %c1_i32_31 dim 1 : vector<16x1024xf32>, i32 -> vector<16x1024xf32>
    %cst_32 = arith.constant 0.000000e+00 : f32
    %70 = vector.shape_cast %38 : vector<1x1024xi1> to vector<1x1024xi1>
    %71 = vector.broadcast %70 : vector<1x1024xi1> to vector<16x1024xi1>
    %72 = vector.broadcast %cst_32 : f32 to vector<16x1024xf32>
    %73 = arith.select %71, %69, %72 : vector<16x1024xi1>, vector<16x1024xf32>
    %c48 = arith.constant 48 : index
    %c0_33 = arith.constant 0 : index
    %74 = vector.load %arg7[%c48, %c0_33] : memref<144x1024xf32, #tpu.memory_space<vmem>>, vector<16x1024xf32>
    tpu.vector_store %arg7[%c48, %c0_33], %73 {strides = array<i32>} : memref<144x1024xf32, #tpu.memory_space<vmem>>, vector<16x1024xf32>,
    %c0_34 = arith.constant 0 : index
    %c0_35 = arith.constant 0 : index
    %75 = vector.load %arg6[%c0_34, %c0_35] : memref<16x1024xf32, #tpu.memory_space<vmem>>, vector<16x1024xf32>
    %c64 = arith.constant 64 : index
    %c0_36 = arith.constant 0 : index
    %76 = vector.load %arg7[%c64, %c0_36] : memref<144x1024xf32, #tpu.memory_space<vmem>>, vector<16x1024xf32>
    tpu.vector_store %arg7[%c64, %c0_36], %75 {strides = array<i32>} : memref<144x1024xf32, #tpu.memory_space<vmem>>, vector<16x1024xf32>,
    %c0_37 = arith.constant 0 : index
    %c0_38 = arith.constant 0 : index
    %77 = vector.load %arg6[%c0_37, %c0_38] : memref<16x1024xf32, #tpu.memory_space<vmem>>, vector<16x1024xf32>
    %c1023_i32 = arith.constant 1023 : i32
    %78 = tpu.dynamic_rotate %77 by %c1023_i32 dim 1 : vector<16x1024xf32>, i32 -> vector<16x1024xf32>
    %cst_39 = arith.constant 0.000000e+00 : f32
    %79 = vector.shape_cast %40 : vector<1x1024xi1> to vector<1x1024xi1>
    %80 = vector.broadcast %79 : vector<1x1024xi1> to vector<16x1024xi1>
    %81 = vector.broadcast %cst_39 : f32 to vector<16x1024xf32>
    %82 = arith.select %80, %78, %81 : vector<16x1024xi1>, vector<16x1024xf32>
    %c80 = arith.constant 80 : index
    %c0_40 = arith.constant 0 : index
    %83 = vector.load %arg7[%c80, %c0_40] : memref<144x1024xf32, #tpu.memory_space<vmem>>, vector<16x1024xf32>
    tpu.vector_store %arg7[%c80, %c0_40], %82 {strides = array<i32>} : memref<144x1024xf32, #tpu.memory_space<vmem>>, vector<16x1024xf32>,
    %c0_41 = arith.constant 0 : index
    %c0_42 = arith.constant 0 : index
    %84 = vector.load %arg6[%c0_41, %c0_42] : memref<16x1024xf32, #tpu.memory_space<vmem>>, vector<16x1024xf32>
    %c1009_i32 = arith.constant 1009 : i32
    %85 = tpu.dynamic_rotate %84 by %c1009_i32 dim 1 : vector<16x1024xf32>, i32 -> vector<16x1024xf32>
    %86 = arith.andi %44, %38 : vector<1x1024xi1>
    %cst_43 = arith.constant 0.000000e+00 : f32
    %87 = vector.shape_cast %86 : vector<1x1024xi1> to vector<1x1024xi1>
    %88 = vector.broadcast %87 : vector<1x1024xi1> to vector<16x1024xi1>
    %89 = vector.broadcast %cst_43 : f32 to vector<16x1024xf32>
    %90 = arith.select %88, %85, %89 : vector<16x1024xi1>, vector<16x1024xf32>
    %c96 = arith.constant 96 : index
    %c0_44 = arith.constant 0 : index
    %91 = vector.load %arg7[%c96, %c0_44] : memref<144x1024xf32, #tpu.memory_space<vmem>>, vector<16x1024xf32>
    tpu.vector_store %arg7[%c96, %c0_44], %90 {strides = array<i32>} : memref<144x1024xf32, #tpu.memory_space<vmem>>, vector<16x1024xf32>,
    %c0_45 = arith.constant 0 : index
    %c0_46 = arith.constant 0 : index
    %92 = vector.load %arg6[%c0_45, %c0_46] : memref<16x1024xf32, #tpu.memory_space<vmem>>, vector<16x1024xf32>
    %c1008_i32 = arith.constant 1008 : i32
    %93 = tpu.dynamic_rotate %92 by %c1008_i32 dim 1 : vector<16x1024xf32>, i32 -> vector<16x1024xf32>
    %cst_47 = arith.constant 0.000000e+00 : f32
    %94 = vector.shape_cast %44 : vector<1x1024xi1> to vector<1x1024xi1>
    %95 = vector.broadcast %94 : vector<1x1024xi1> to vector<16x1024xi1>
    %96 = vector.broadcast %cst_47 : f32 to vector<16x1024xf32>
    %97 = arith.select %95, %93, %96 : vector<16x1024xi1>, vector<16x1024xf32>
    %c112 = arith.constant 112 : index
    %c0_48 = arith.constant 0 : index
    %98 = vector.load %arg7[%c112, %c0_48] : memref<144x1024xf32, #tpu.memory_space<vmem>>, vector<16x1024xf32>
    tpu.vector_store %arg7[%c112, %c0_48], %97 {strides = array<i32>} : memref<144x1024xf32, #tpu.memory_space<vmem>>, vector<16x1024xf32>,
    %c0_49 = arith.constant 0 : index
    %c0_50 = arith.constant 0 : index
    %99 = vector.load %arg6[%c0_49, %c0_50] : memref<16x1024xf32, #tpu.memory_space<vmem>>, vector<16x1024xf32>
    %c1007_i32 = arith.constant 1007 : i32
    %100 = tpu.dynamic_rotate %99 by %c1007_i32 dim 1 : vector<16x1024xf32>, i32 -> vector<16x1024xf32>
    %101 = arith.andi %44, %40 : vector<1x1024xi1>
    %cst_51 = arith.constant 0.000000e+00 : f32
    %102 = vector.shape_cast %101 : vector<1x1024xi1> to vector<1x1024xi1>
    %103 = vector.broadcast %102 : vector<1x1024xi1> to vector<16x1024xi1>
    %104 = vector.broadcast %cst_51 : f32 to vector<16x1024xf32>
    %105 = arith.select %103, %100, %104 : vector<16x1024xi1>, vector<16x1024xf32>
    %c128 = arith.constant 128 : index
    %c0_52 = arith.constant 0 : index
    %106 = vector.load %arg7[%c128, %c0_52] : memref<144x1024xf32, #tpu.memory_space<vmem>>, vector<16x1024xf32>
    tpu.vector_store %arg7[%c128, %c0_52], %105 {strides = array<i32>} : memref<144x1024xf32, #tpu.memory_space<vmem>>, vector<16x1024xf32>,
    %c0_53 = arith.constant 0 : index
    %c0_54 = arith.constant 0 : index
    %107 = vector.load %arg3[%c0_53, %c0_54] : memref<24x144xf32, #tpu.memory_space<vmem>>, vector<24x144xf32>
    %c0_55 = arith.constant 0 : index
    %c0_56 = arith.constant 0 : index
    %108 = vector.load %arg7[%c0_55, %c0_56] : memref<144x1024xf32, #tpu.memory_space<vmem>>, vector<144x1024xf32>
    %cst_57 = arith.constant dense<0.000000e+00> : vector<24x1024xf32>
    %109 = tpu.matmul %107, %108, %cst_57 {dimension_numbers = #tpu.dot_dimension_numbers<[1], [0], [0], [1], [0, 0, 1, 1], [], []>} : vector<24x144xf32>, vector<144x1024xf32>, vector<24x1024xf32> -> vector<24x1024xf32>
    %c0_58 = arith.constant 0 : index
    %c0_59 = arith.constant 0 : index
    %110 = vector.load %arg4[%c0_58, %c0_59] : memref<24x1xf32, #tpu.memory_space<vmem>>, vector<24x1xf32>
    %111 = vector.broadcast %110 : vector<24x1xf32> to vector<24x1024xf32>
    %112 = arith.addf %109, %111 : vector<24x1024xf32>
    %c0_60 = arith.constant 0 : index
    %c0_61 = arith.constant 0 : index
    %113 = vector.load %arg2[%c0_60, %c0_61] : memref<8x1024xf32, #tpu.memory_space<vmem>>, vector<8x1024xf32>
    %114 = vector.extract_strided_slice %112 {offsets = [0, 0], sizes = [8, 1024], strides = [1, 1]} : vector<24x1024xf32> to vector<8x1024xf32>
    %115 = arith.negf %114 : vector<8x1024xf32>
    %116 = math.exp %115 : vector<8x1024xf32>
    %cst_62 = arith.constant 1.000000e+00 : f32
    %117 = vector.broadcast %cst_62 : f32 to vector<8x1024xf32>
    %118 = arith.addf %117, %116 : vector<8x1024xf32>
    %119 = arith.divf %117, %118 : vector<8x1024xf32>
    %120 = vector.extract_strided_slice %112 {offsets = [8, 0], sizes = [8, 1024], strides = [1, 1]} : vector<24x1024xf32> to vector<8x1024xf32>
    %121 = arith.negf %120 : vector<8x1024xf32>
    %122 = math.exp %121 : vector<8x1024xf32>
    %cst_63 = arith.constant 1.000000e+00 : f32
    %123 = vector.broadcast %cst_63 : f32 to vector<8x1024xf32>
    %124 = arith.addf %123, %122 : vector<8x1024xf32>
    %125 = arith.divf %123, %124 : vector<8x1024xf32>
    %126 = vector.extract_strided_slice %112 {offsets = [16, 0], sizes = [8, 1024], strides = [1, 1]} : vector<24x1024xf32> to vector<8x1024xf32>
    %127 = math.tanh %126 : vector<8x1024xf32>
    %128 = arith.mulf %119, %113 : vector<8x1024xf32>
    %cst_64 = arith.constant 1.000000e+00 : f32
    %129 = vector.broadcast %cst_64 : f32 to vector<8x1024xf32>
    %130 = arith.subf %129, %125 : vector<8x1024xf32>
    %131 = arith.mulf %128, %130 : vector<8x1024xf32>
    %132 = arith.mulf %125, %127 : vector<8x1024xf32>
    %133 = arith.addf %131, %132 : vector<8x1024xf32>
    %c0_65 = arith.constant 0 : index
    %c0_66 = arith.constant 0 : index
    %134 = vector.load %arg5[%c0_65, %c0_66] : memref<8x1024xf32, #tpu.memory_space<vmem>>, vector<8x1024xf32>
    tpu.vector_store %arg5[%c0_65, %c0_66], %133 {strides = array<i32>} : memref<8x1024xf32, #tpu.memory_space<vmem>>, vector<8x1024xf32>,
    return
  }
  func.func @transform_0(%arg0: i32) -> (i32, i32) {
    %c0_i32 = arith.constant 0 : i32
    %c0_i32_0 = arith.constant 0 : i32
    return %c0_i32, %arg0 : i32, i32
  }
  func.func @transform_1(%arg0: i32) -> (i32, i32) {
    %c0_i32 = arith.constant 0 : i32
    %c0_i32_0 = arith.constant 0 : i32
    return %c0_i32, %arg0 : i32, i32
  }
  func.func @transform_2(%arg0: i32) -> (i32, i32) {
    %c0_i32 = arith.constant 0 : i32
    %c0_i32_0 = arith.constant 0 : i32
    %c0_i32_1 = arith.constant 0 : i32
    return %c0_i32, %c0_i32_0 : i32, i32
  }
  func.func @transform_3(%arg0: i32) -> (i32, i32) {
    %c0_i32 = arith.constant 0 : i32
    %c0_i32_0 = arith.constant 0 : i32
    %c0_i32_1 = arith.constant 0 : i32
    return %c0_i32, %c0_i32_0 : i32, i32
  }
  func.func @transform_4(%arg0: i32) -> (i32, i32) {
    %c0_i32 = arith.constant 0 : i32
    %c0_i32_0 = arith.constant 0 : i32
    return %c0_i32, %arg0 : i32, i32
  }
}

</mosaic_0001>

<bundles_post_ra>
// kernel: tpu_custom_call.1
= control target key start
LH: loop header
LB: loop body
LE: loop exit
PB: predicated region body
PF: predicated region fallthrough
CT: control target
= control target key end

     0   :  { %9 = vsyncpa [#allocation5], 0  ;;  %s4117_s0 = inlined_call_operand.hbm [shape: f32[8,1024], index: 0, kind: input, shape index: {}]   ;;  %s4118_s1 = inlined_call_operand.hbm [shape: f32[8,1024], index: 1, kind: input, shape index: {}]   ;;  %s4119_s2 = inlined_call_operand.hbm [shape: f32[24,144], index: 2, kind: input, shape index: {}]   ;;  %s4120_s3 = inlined_call_operand.vmem [shape: f32[24,1], index: 3, kind: input, shape index: {}]   ;;  %s4121_s4 = inlined_call_operand.hbm [shape: f32[8,1024], index: 4, kind: output, shape index: {}]  }
   0x1   :  { %10 = vsyncpa [#allocation8], 0 }
   0x2   :  { %11 = vsyncpa [#allocation6], 0  ;;  %s2832_s15 = smov [#allocation7]   ;;  %s2833_s17 = smov [#allocation4]  }
   0x3   :  { %s28_s16 = sshll.u32 %s2832_s15, 4  ;;  %s18_s18 = sshll.u32 %s2833_s17, 4  ;;  %s29_s16 = int_to_ptr.vmem [resolvable:$true] %s28_s16  ;;  %s19_s18 = int_to_ptr.vmem [resolvable:$true] %s18_s18 }
   0x4   :  { %s2738_s21 = scalar_lea.hbm %s4118_s1, 1024 }
   0x5   :  { %p2739_p0 = scmp.ne.s32.totalorder %s4118_s1, %s2738_s21  ;;  %p2742_p1 = scmp.lt.u32.totalorder %s2738_s21, %s4118_s1 }
   0x7   :  { %p2744_p2 = pnand %p2742_p1, %p2739_p0 }
   0x9   :  { %2747 = shalt.err (!%p2744_p2)
}
   0xa   :  { %s2748_s26 = scalar_lea.vmem %s29_s16, 1024  ;;  %p2753_p4 = scmp.lt.s32.totalorder %s29_s16, %s29_s16 }
   0xb   :  { %p2749_p3 = scmp.ne.s32.totalorder %s29_s16, %s2748_s26  ;;  %p2754_p5 = scmp.lt.s32.totalorder %s2748_s26, %s2748_s26 }
   0xd   :  { %p2755_p6 = por %p2754_p5, %p2753_p4 }
   0xf   :  { %p2756_p7 = pnand %p2755_p6, %p2749_p3 }
  0x11   :  { %2759 = shalt.err (!%p2756_p7)
}
  0x12   :  { %31 = dma.hbm_to_vmem [thread:$0]  %s4118_s1, 1024, %s29_s16, [#allocation8]  }
  0x13   :  { %s2760_s5 = scalar_lea.hbm %s4117_s0, 1024 }
  0x14   :  { %p2761_p8 = scmp.ne.s32.totalorder %s4117_s0, %s2760_s5  ;;  %p2764_p9 = scmp.lt.u32.totalorder %s2760_s5, %s4117_s0 }
  0x16   :  { %p2766_p10 = pnand %p2764_p9, %p2761_p8 }
  0x18   :  { %2769 = shalt.err (!%p2766_p10)
}
  0x19   :  { %s2770_s10 = scalar_lea.vmem %s19_s18, 1024  ;;  %p2775_p12 = scmp.lt.s32.totalorder %s19_s18, %s19_s18 }
  0x1a   :  { %p2771_p11 = scmp.ne.s32.totalorder %s19_s18, %s2770_s10  ;;  %p2776_p13 = scmp.lt.s32.totalorder %s2770_s10, %s2770_s10 }
  0x1c   :  { %p2777_p0 = por %p2776_p13, %p2775_p12 }
  0x1e   :  { %p2778_p1 = pnand %p2777_p0, %p2771_p11 }
  0x20   :  { %2781 = shalt.err (!%p2778_p1)
}
  0x21   :  { %21 = dma.hbm_to_vmem [thread:$0]  %s4117_s0, 1024, %s19_s18, [#allocation5]  }
  0x22   :  { %s2834_s12 = smov [#allocation9]   ;;  %s2782_s16 = scalar_lea.hbm %s4119_s2, 768 }
  0x23   :  { %s37_s13 = sshll.u32 %s2834_s12, 4  ;;  %p2783_p2 = scmp.ne.s32.totalorder %s4119_s2, %s2782_s16  ;;  %s38_s13 = int_to_ptr.vmem [resolvable:$true] %s37_s13 }
  0x24   :  { %p2786_p3 = scmp.lt.u32.totalorder %s2782_s16, %s4119_s2 }
  0x26   :  { %p2788_p4 = pnand %p2786_p3, %p2783_p2 }
  0x28   :  { %2791 = shalt.err (!%p2788_p4)
}
  0x29   :  { %s2792_s22 = scalar_lea.vmem %s38_s13, 768  ;;  %p2797_p6 = scmp.lt.s32.totalorder %s38_s13, %s38_s13 }
  0x2a   :  { %p2793_p5 = scmp.ne.s32.totalorder %s38_s13, %s2792_s22  ;;  %p2798_p7 = scmp.lt.s32.totalorder %s2792_s22, %s2792_s22 }
  0x2c   :  { %p2799_p8 = por %p2798_p7, %p2797_p6 }
  0x2e   :  { %p2800_p9 = pnand %p2799_p8, %p2793_p5 }
  0x30   :  { %2803 = shalt.err (!%p2800_p9)
}
  0x31   :  { %s2835_s0 = smov 256   ;;  %s2836_s18 = smov 16  }
  0x32   :  { %43 = dma.hbm_to_vmem [thread:$0]  %s4119_s2, 768, %s38_s13, [#allocation8], %s2835_s0, %s2835_s0, %s2836_s18  }
  0x33   :  { %2826 = dma.done.wait [#allocation5], 1024  }
  0x34   :  { %2827 = vsyncadd [#allocation5], 4294966272 }
  0x35   :  { %2828 = dma.done.wait [#allocation8], 1792  }
  0x36   :  { %2829 = vsyncadd [#allocation8], 4294965504  ;;  %v2908_v0 = vld [vmem:[#allocation4 + $0x10] sm:$0xff]  ;;  %v2912_v2 = vld [vmem:[#allocation4] sm:$0xff]  ;;  %s2837_s2 = smov 17   ;;  %s2838_s25 = smov 15   ;;  %v87_v29 = vlaneseq }
  0x37   :  { %v2910_v1 = vld [vmem:[#allocation7 + $0x10] sm:$0xff]  ;;  %v2916_v4 = vld [vmem:[#allocation7] sm:$0xff]  ;;  %v2918_v5 = vld [vmem:[#allocation4 + $0x18] sm:$0xff]  ;;  %s2839_s26 = smov 1   ;;  %s2840_s27 = smov 127   ;;  %vm4123_vm0 = vcmask 130048  }
  0x38   :  { %v2338_v3 = vpack.i.bf16 %v2910_v1, %v2908_v0  ;;  %v2920_v6 = vld [vmem:[#allocation7 + $0x18] sm:$0xff]  ;;  %v2924_v7 = vpack.i.bf16 %v2916_v4, %v2912_v2  ;;  %v2926_v8 = vld [vmem:[#allocation4 + $0x8] sm:$0xff]  ;;  %v2139_v16 = vpack.c.bf16 %v2916_v4, %v2912_v2  ;;  %v2189_v18 = vpack.c.bf16 %v2910_v1, %v2908_v0  ;;  %v59_v19 = vld [vmem:[#allocation4 + $0x20] sm:$0xff]  ;;  %s2841_s28 = smov 113   ;;  %s2842_s29 = smov 112  }
  0x39   :  { %v2928_v9 = vld [vmem:[#allocation7 + $0x8] sm:$0xff]  ;;  %v2343_v10 = vpack.i.bf16 %v2920_v6, %v2918_v5  ;;  %v62_v12 = vld [vmem:[#allocation4 + $0x38] sm:$0xff]  ;;  %v2187_v17 = vpack.c.bf16 %v2920_v6, %v2918_v5  ;;  %v75_v20 = vld [vmem:[#allocation7 + $0x20] sm:$0xff]  ;;  %s2843_s30 = smov 111   ;;  %v3019_v30 = vand.u32 127, %v87_v29 }
  0x3a   :  { %2339 = vrot.lane.b32.xlu1 %v2338_v3, %s2837_s2  ;;  %2329 = vrot.lane.b32.xlu0 %v2924_v7, %s2837_s2  ;;  %v2333_v11 = vpack.i.bf16 %v2928_v9, %v2926_v8  ;;  %v78_v13 = vld [vmem:[#allocation7 + $0x38] sm:$0xff]  ;;  %v2137_v15 = vpack.c.bf16 %v2928_v9, %v2926_v8  ;;  %v2443_v21 = vpack.i.bf16 %v75_v20, %v59_v19  ;;  %v60_v22 = vld [vmem:[#allocation4 + $0x28] sm:$0xff]  ;;  %v61_v26 = vld [vmem:[#allocation4 + $0x30] sm:$0xff] }
  0x3b   :  { %v2939_v14 = vpack.i.bf16 %v78_v13, %v62_v12  ;;  %v76_v23 = vld [vmem:[#allocation7 + $0x28] sm:$0xff]  ;;  %v77_v27 = vld [vmem:[#allocation7 + $0x30] sm:$0xff]  ;;  %v90_v31 = vadd.s32 256, %v3019_v30  ;;  %v3027_v32 = vadd.s32 384, %v3019_v30  ;;  %v3030_v33 = vadd.s32 128, %v3019_v30 }
  0x3c   :  { %v2993_v24 = vld [vmem:[#allocation9 + $0x8] sm:$0xff]  ;;  %v2533_v25 = vpack.i.bf16 %v76_v23, %v60_v22  ;;  %v3004_v28 = vpack.i.bf16 %v77_v27, %v61_v26  ;;  %v100_v37 = vand.u32 255, %v3019_v30  ;;  %vm4124_vm4 = vcmp.lt.s32.totalorder %v3019_v30, 17 }
  0x3d   :  { %1974 = vmatprep.mubr.msk.f32.mxu0 %vm4123_vm0, %v2993_v24  ;;  %1977 = vmatprep.mubr.msk.f32.mxu1 %vm4123_vm0, %v2993_v24  ;;  %v114_v34 = vand.u32 255, %v90_v31  ;;  %v121_v35 = vand.u32 255, %v3027_v32  ;;  %v107_v36 = vand.u32 255, %v3030_v33  ;;  %vm4122_vm14 = vcmp.lt.s32.totalorder %v3019_v30, 16 }
  0x3e   :  { %2344 = vrot.lane.b32.xlu1 %v2343_v10, %s2837_s2  ;;  %2334 = vrot.lane.b32.xlu0 %v2333_v11, %s2837_s2  ;;  %v3052_v42 = vand.u32 15, %v100_v37  ;;  %vm3068_vm7 = vcmp.ge.s32.totalorder %v100_v37, 16 }
  0x3f   :  { %v3040_v38 = vand.u32 15, %v114_v34  ;;  %v3046_v39 = vand.u32 15, %v121_v35  ;;  %v3050_v41 = vand.u32 15, %v107_v36  ;;  %vm3057_vm2 = vcmp.ge.s32.totalorder %v114_v34, 16  ;;  %vm2123_vm15 = vmpackc.low %vm3068_vm7, %vm3068_vm7 }
  0x40   :  { %vm288_vm6 = vcmp.ge.s32.totalorder %v3052_v42, 1  ;;  %vm296_vm0 = vcmp.le.s32.totalorder %v3052_v42, 14 }
  0x41   :  { %vm290_vm1 = vcmp.ge.s32.totalorder %v3040_v38, 1  ;;  %vm291_vm3 = vcmp.ge.s32.totalorder %v3046_v39, 1  ;;  %vm289_vm5 = vcmp.ge.s32.totalorder %v3050_v41, 1  ;;  %vm3124_vm12 = vmand %vm3068_vm7, %vm288_vm6 }
  0x42   :  { %2354 = vrot.lane.b32.xlu1 %v2924_v7, %s2836_s18  ;;  %2349 = vrot.lane.b32.xlu0 %v2939_v14, %s2837_s2  ;;  %vm3078_vm8 = vmand %vm3057_vm2, %vm290_vm1 }
  0x43   :  { %vm3086_vm9 = vmpackc.low %vm291_vm3, %vm291_vm3 }
  0x44   :  { %vm3103_vm10 = vmpackc.low %vm289_vm5, %vm289_vm5 }
  0x45   :  { %vm2168_vm11 = vmpackc.low %vm3078_vm8, %vm3078_vm8  ;;  %vm602_vm8 = vcmp.lt.s32.totalorder %v3019_v30, 15 }
  0x46   :  { %2364 = vrot.lane.b32.xlu1 %v2338_v3, %s2836_s18  ;;  %2359 = vrot.lane.b32.xlu0 %v2333_v11, %s2836_s18  ;;  %vm2118_vm13 = vmpackc.low %vm3124_vm12, %vm3124_vm12  ;;  %vm297_vm12 = vcmp.le.s32.totalorder %v3050_v41, 14 }
  0x4a   :  { %2374 = vrot.lane.b32.xlu1 %v2939_v14, %s2836_s18  ;;  %2369 = vrot.lane.b32.xlu0 %v2343_v10, %s2836_s18 }
  0x4e   :  { %2384 = vrot.lane.b32.xlu1 %v2333_v11, %s2838_s25  ;;  %2379 = vrot.lane.b32.xlu0 %v2924_v7, %s2838_s25 }
  0x52   :  { %2394 = vrot.lane.b32.xlu1 %v2343_v10, %s2838_s25  ;;  %2389 = vrot.lane.b32.xlu0 %v2338_v3, %s2838_s25 }
  0x56   :  { %2404 = vrot.lane.b32.xlu1 %v2924_v7, %s2839_s26  ;;  %2399 = vrot.lane.b32.xlu0 %v2939_v14, %s2838_s25 }
  0x5a   :  { %2414 = vrot.lane.b32.xlu1 %v2338_v3, %s2839_s26  ;;  %2409 = vrot.lane.b32.xlu0 %v2333_v11, %s2839_s26 }
  0x5e   :  { %2424 = vrot.lane.b32.xlu1 %v2939_v14, %s2839_s26  ;;  %2419 = vrot.lane.b32.xlu0 %v2343_v10, %s2839_s26 }
  0x62   :  { %2434 = vrot.lane.b32.xlu1 %v2338_v3, %s2840_s27  ;;  %2429 = vrot.lane.b32.xlu0 %v2333_v11, %s2840_s27 }
  0x66   :  { %2444 = vrot.lane.b32.xlu1 %v2443_v21, %s2840_s27  ;;  %2439 = vrot.lane.b32.xlu0 %v2343_v10, %s2840_s27 }
  0x6a   :  { %2454 = vrot.lane.b32.xlu1 %v2333_v11, %s2841_s28  ;;  %2449 = vrot.lane.b32.xlu0 %v2924_v7, %s2840_s27 }
  0x6e   :  { %2464 = vrot.lane.b32.xlu1 %v2343_v10, %s2841_s28  ;;  %2459 = vrot.lane.b32.xlu0 %v2338_v3, %s2841_s28 }
  0x72   :  { %2474 = vrot.lane.b32.xlu1 %v2924_v7, %s2841_s28  ;;  %2469 = vrot.lane.b32.xlu0 %v2443_v21, %s2841_s28 }
  0x76   :  { %2484 = vrot.lane.b32.xlu1 %v2338_v3, %s2842_s29  ;;  %2479 = vrot.lane.b32.xlu0 %v2333_v11, %s2842_s29 }
  0x7a   :  { %2494 = vrot.lane.b32.xlu1 %v2443_v21, %s2842_s29  ;;  %2489 = vrot.lane.b32.xlu0 %v2343_v10, %s2842_s29 }
  0x7e   :  { %2504 = vrot.lane.b32.xlu1 %v2333_v11, %s2843_s30  ;;  %2499 = vrot.lane.b32.xlu0 %v2924_v7, %s2842_s29 }
  0x82   :  { %2514 = vrot.lane.b32.xlu1 %v2343_v10, %s2843_s30  ;;  %2509 = vrot.lane.b32.xlu0 %v2338_v3, %s2843_s30 }
  0x86   :  { %2524 = vrot.lane.b32.xlu1 %v2924_v7, %s2843_s30  ;;  %2519 = vrot.lane.b32.xlu0 %v2443_v21, %s2843_s30 }
  0x8a   :  { %2534 = vrot.lane.b32.xlu1 %v2533_v25, %s2837_s2  ;;  %2529 = vrot.lane.b32.xlu0 %v2443_v21, %s2837_s2 }
  0x8e   :  { %2544 = vrot.lane.b32.xlu1 %v2443_v21, %s2836_s18  ;;  %2539 = vrot.lane.b32.xlu0 %v3004_v28, %s2837_s2 }
  0x92   :  { %2554 = vrot.lane.b32.xlu1 %v3004_v28, %s2836_s18  ;;  %2549 = vrot.lane.b32.xlu0 %v2533_v25, %s2836_s18 }
  0x96   :  { %2564 = vrot.lane.b32.xlu1 %v2533_v25, %s2838_s25  ;;  %2559 = vrot.lane.b32.xlu0 %v2443_v21, %s2838_s25 }
  0x9a   :  { %2574 = vrot.lane.b32.xlu1 %v2443_v21, %s2839_s26  ;;  %2569 = vrot.lane.b32.xlu0 %v3004_v28, %s2838_s25 }
  0x9e   :  { %2584 = vrot.lane.b32.xlu1 %v3004_v28, %s2839_s26  ;;  %2579 = vrot.lane.b32.xlu0 %v2533_v25, %s2839_s26 }
  0xa2   :  { %2594 = vrot.lane.b32.xlu1 %v3004_v28, %s2840_s27  ;;  %2589 = vrot.lane.b32.xlu0 %v2533_v25, %s2840_s27 }
  0xa6   :  { %2604 = vrot.lane.b32.xlu1 %v2533_v25, %s2841_s28  ;;  %2599 = vrot.lane.b32.xlu0 %v2939_v14, %s2840_s27 }
  0xaa   :  { %2614 = vrot.lane.b32.xlu1 %v2939_v14, %s2841_s28  ;;  %2609 = vrot.lane.b32.xlu0 %v3004_v28, %s2841_s28 }
  0xac   :  { %v2340_v40 = vpop.permute.xlu1 %2339  ;;  %v2330_v43 = vpop.permute.xlu0 %2329 }
  0xad   :  { %v2342_v47 = vunpack.i.h.bf16 %v2340_v40  ;;  %v2341_v48 = vunpack.i.l.bf16 %v2340_v40  ;;  %v2332_v53 = vunpack.i.h.bf16 %v2330_v43  ;;  %v2331_v54 = vunpack.i.l.bf16 %v2330_v43 }
  0xae   :  { %2624 = vrot.lane.b32.xlu1 %v3004_v28, %s2842_s29  ;;  %2619 = vrot.lane.b32.xlu0 %v2533_v25, %s2842_s29 }
  0xb0   :  { %v3064_v45 = vpop.permute.xlu1 %2344  ;;  %v2335_v51 = vpop.permute.xlu0 %2334 }
  0xb1   :  { %v2347_v49 = vunpack.i.h.bf16 %v3064_v45  ;;  %v2346_v50 = vunpack.i.l.bf16 %v3064_v45  ;;  %v2337_v55 = vunpack.i.h.bf16 %v2335_v51  ;;  %v2336_v56 = vunpack.i.l.bf16 %v2335_v51 }
  0xb2   :  { %2634 = vrot.lane.b32.xlu1 %v2533_v25, %s2843_s30  ;;  %2629 = vrot.lane.b32.xlu0 %v2939_v14, %s2842_s29 }
  0xb3   :  { %v377_v58 = vsel %vm4124_vm4, %v2341_v48, %v2346_v50  ;;  %v378_v59 = vsel %vm4124_vm4, %v2342_v47, %v2347_v49  ;;  %v381_v63 = vsel %vm4124_vm4, %v2331_v54, %v2336_v56  ;;  %v382_v3 = vsel %vm4124_vm4, %v2332_v53, %v2337_v55 }
  0xb4   :  { %v2355_v61 = vpop.permute.xlu1 %2354  ;;  %v2164_v62 = vpack.c.bf16 %v378_v59, %v377_v58  ;;  %v379_v7 = vsel %vm4124_vm4, %v2336_v56, %v2341_v48  ;;  %v3116_v10 = vpop.permute.xlu0 %2349  ;;  %v2114_v11 = vpack.c.bf16 %v382_v3, %v381_v63  ;;  %v380_v12 = vsel %vm4124_vm4, %v2337_v55, %v2342_v47  ;;  %v1438_v59 = vld [vmem:[%s4120_s3] sm:$0xff] }
  0xb5   :  { %v2352_v19 = vunpack.i.h.bf16 %v3116_v10  ;;  %v2351_v20 = vunpack.i.l.bf16 %v3116_v10  ;;  %v2167_v21 = vpack.c.bf16 %v380_v12, %v379_v7  ;;  %v2844_v3 = vmov 0  }
  0xb6   :  { %2166 = vmatprep.subr.msk.bf16.mxu1 %vm3086_vm9, %v2164_v62  ;;  %2644 = vrot.lane.b32.xlu1 %v2939_v14, %s2843_s30  ;;  %v2357_v14 = vunpack.i.h.bf16 %v2355_v61 }
  0xb7   :  { %2639 = vrot.lane.b32.xlu0 %v3004_v28, %s2843_s30  ;;  %2116 = vmatprep.subr.msk.bf16.mxu0 %vm3103_vm10, %v2114_v11  ;;  %v383_v23 = vsel %vm4124_vm4, %v2351_v20, %v2331_v54  ;;  %v384_v25 = vsel %vm4124_vm4, %v2352_v19, %v2332_v53  ;;  %v2356_v28 = vunpack.i.l.bf16 %v2355_v61  ;;  %v1439_v54 = vld [vmem:[%s4120_s3 + $0x8] sm:$0xff] }
  0xb8   :  { %2169 = vmatpush1.bf16.msk.msra.mxu1 %vm2168_vm11, %v2167_v21  ;;  %v2365_v22 = vpop.permute.xlu1 %2364  ;;  %v2360_v26 = vpop.permute.xlu0 %2359  ;;  %v2117_v27 = vpack.c.bf16 %v384_v25, %v383_v23  ;;  %2649 = vset.pattern.permute.xlu1 %v2844_v3  ;;  %vm2173_vm11 = vmpackc.low %vm3057_vm2, %vm3057_vm2 }
  0xb9   :  { %v2367_v29 = vunpack.i.h.bf16 %v2365_v22  ;;  %v2362_v31 = vunpack.i.h.bf16 %v2360_v26  ;;  %v2361_v34 = vunpack.i.l.bf16 %v2360_v26  ;;  %v2366_v37 = vunpack.i.l.bf16 %v2365_v22  ;;  %2648 = vset.pattern.permute.xlu0 %v2844_v3 }
  0xba   :  { %2119 = vmatpush1.bf16.msk.msra.mxu0 %vm2118_vm13, %v2117_v27  ;;  %1448 = vperm.xlu1 %2649, %v1439_v54   ;;  %vm298_vm13 = vcmp.le.s32.totalorder %v3040_v38, 14 }
  0xbb   :  { %v502_v43 = vsel %vm4122_vm14, %v2356_v28, %v2361_v34  ;;  %v503_v47 = vsel %vm4122_vm14, %v2357_v14, %v2362_v31  ;;  %v501_v55 = vsel %vm4122_vm14, %v2362_v31, %v2367_v29  ;;  %v500_v61 = vsel %vm4122_vm14, %v2361_v34, %v2366_v37  ;;  %1443 = vperm.xlu0 %2648, %v1438_v59  }
  0xbc   :  { %v3150_v40 = vpop.permute.xlu1 %2374  ;;  %v3158_v52 = vpop.permute.xlu0 %2369  ;;  %v2120_v53 = vpack.c.bf16 %v503_v47, %v502_v43  ;;  %v2172_v26 = vpack.c.bf16 %v501_v55, %v500_v61 }
  0xbd   :  { %v2377_v48 = vunpack.i.h.bf16 %v3150_v40  ;;  %v2376_v51 = vunpack.i.l.bf16 %v3150_v40  ;;  %v2372_v56 = vunpack.i.h.bf16 %v3158_v52  ;;  %v2371_v58 = vunpack.i.l.bf16 %v3158_v52 }
  0xbe   :  { %2121 = vmatprep.subr.bf16.mxu0 %v2120_v53 }
  0xbf   :  { %v504_v62 = vsel %vm4122_vm14, %v2376_v51, %v2356_v28  ;;  %v505_v63 = vsel %vm4122_vm14, %v2377_v48, %v2357_v14  ;;  %v498_v12 = vsel %vm4122_vm14, %v2366_v37, %v2371_v58  ;;  %v499_v13 = vsel %vm4122_vm14, %v2367_v29, %v2372_v56  ;;  %v1440_v14 = vld [vmem:[%s4120_s3 + $0x10] sm:$0xff]  ;;  %vm3214_vm14 = vmpackc.low %vm297_vm12, %vm297_vm12  ;;  %s2845_s3 = smov [#allocation10]  }
  0xc0   :  { %v2122_v7 = vpack.c.bf16 %v505_v63, %v504_v62  ;;  %v2385_v11 = vpop.permute.xlu1 %2384  ;;  %v2380_v23 = vpop.permute.xlu0 %2379  ;;  %v2170_v25 = vpack.c.bf16 %v499_v13, %v498_v12  ;;  %1453 = vperm.xlu1 %2649, %v1440_v14   ;;  %s1964_s1 = sshll.u32 %s2845_s3, 4  ;;  %s1965_s1 = int_to_ptr.vmem [resolvable:$true] %s1964_s1 }
  0xc1   :  { %v2387_v21 = vunpack.i.h.bf16 %v2385_v11  ;;  %v2386_v22 = vunpack.i.l.bf16 %v2385_v11  ;;  %v2382_v27 = vunpack.i.h.bf16 %v2380_v23  ;;  %v2381_v28 = vunpack.i.l.bf16 %v2380_v23  ;;  %s2804_s11 = scalar_lea.vmem %s1965_s1, 1024  ;;  %p2809_p11 = scmp.lt.s32.totalorder %s1965_s1, %s1965_s1 }
  0xc2   :  { %2124 = vmatpush1.bf16.msk.msra.mxu0 %vm2123_vm15, %v2122_v7  ;;  %2171 = vmatprep.subr.bf16.mxu1 %v2170_v25  ;;  %vm4125_vm15 = vcmp.le.s32.totalorder %v3046_v39, 14  ;;  %p2805_p10 = scmp.ne.s32.totalorder %s1965_s1, %s2804_s11  ;;  %p2810_p12 = scmp.lt.s32.totalorder %s2804_s11, %s2804_s11 }
  0xc3   :  { %v616_v29 = vsel %vm602_vm8, %v2382_v27, %v2387_v21  ;;  %v615_v31 = vsel %vm602_vm8, %v2381_v28, %v2386_v22  ;;  %2174 = vmatpush1.bf16.msk.msra.mxu1 %vm2173_vm11, %v2172_v26  ;;  %vm3225_vm11 = vmand %vm3057_vm2, %vm298_vm13 }
  0xc4   :  { %v3209_v34 = vpop.permute.xlu1 %2394  ;;  %v2125_v43 = vpack.c.bf16 %v616_v29, %v615_v31  ;;  %v2390_v54 = vpop.permute.xlu0 %2389  ;;  %vm3235_vm4 = vmpackc.low %vm4125_vm15, %vm4125_vm15  ;;  %p2811_p13 = por %p2810_p12, %p2809_p11 }
  0xc5   :  { %v2397_v47 = vunpack.i.h.bf16 %v3209_v34  ;;  %v2396_v53 = vunpack.i.l.bf16 %v3209_v34  ;;  %v2392_v59 = vunpack.i.h.bf16 %v2390_v54  ;;  %v2391_v61 = vunpack.i.l.bf16 %v2390_v54  ;;  %vm2179_vm2 = vmpackc.low %vm3225_vm11, %vm3225_vm11 }
  0xc6   :  { %2127 = vmatprep.subr.msk.bf16.mxu0 %vm3214_vm14, %v2125_v43  ;;  %vm3260_vm15 = vmand %vm3068_vm7, %vm296_vm0  ;;  %vm723_vm11 = vcmp.lt.s32.totalorder %v3019_v30, 1  ;;  %p2812_p0 = pnand %p2811_p13, %p2805_p10 }
  0xc7   :  { %v612_v44 = vsel %vm602_vm8, %v2392_v59, %v2397_v47  ;;  %v614_v63 = vsel %vm602_vm8, %v2387_v21, %v2392_v59  ;;  %v611_v3 = vsel %vm602_vm8, %v2391_v61, %v2396_v53  ;;  %v613_v7 = vsel %vm602_vm8, %v2386_v22, %v2391_v61  ;;  %vm2129_vm7 = vmpackc.low %vm3260_vm15, %vm3260_vm15 }
  0xc8   :  { %v2405_v11 = vpop.permute.xlu1 %2404  ;;  %v2175_v12 = vpack.c.bf16 %v612_v44, %v611_v3  ;;  %v2178_v13 = vpack.c.bf16 %v614_v63, %v613_v7  ;;  %v3254_v23 = vpop.permute.xlu0 %2399  ;;  %vm3309_vm15 = vmpackc.low %vm288_vm6, %vm288_vm6  ;;  %vm4144_vm6 = vcmp.lt.s32.totalorder %v3019_v30, 127 }
  0xc9   :  { %v2402_v25 = vunpack.i.h.bf16 %v3254_v23  ;;  %v2401_v22 = vunpack.i.l.bf16 %v3254_v23  ;;  %v2407_v43 = vunpack.i.h.bf16 %v2405_v11  ;;  %v2406_v54 = vunpack.i.l.bf16 %v2405_v11 }
  0xca   :  { %2177 = vmatprep.subr.msk.bf16.mxu1 %vm3235_vm4, %v2175_v12 }
  0xcb   :  { %v617_v14 = vsel %vm602_vm8, %v2401_v22, %v2381_v28  ;;  %v618_v46 = vsel %vm602_vm8, %v2402_v25, %v2382_v27  ;;  %2180 = vmatpush1.bf16.msk.msra.mxu1 %vm2179_vm2, %v2178_v13 }
  0xcc   :  { %v2415_v26 = vpop.permute.xlu1 %2414  ;;  %v2128_v29 = vpack.c.bf16 %v618_v46, %v617_v14  ;;  %v2410_v31 = vpop.permute.xlu0 %2409 }
  0xcd   :  { %v2412_v55 = vunpack.i.h.bf16 %v2410_v31  ;;  %v2411_v59 = vunpack.i.l.bf16 %v2410_v31  ;;  %v2417_v28 = vunpack.i.h.bf16 %v2415_v26  ;;  %v2416_v61 = vunpack.i.l.bf16 %v2415_v26 }
  0xce   :  { %2130 = vmatpush1.bf16.msk.msra.mxu0 %vm2129_vm7, %v2128_v29  ;;  %vm4140_vm7 = vcmp.lt.s32.totalorder %v3019_v30, 112 }
  0xcf   :  { %v737_v27 = vsel %vm723_vm11, %v2407_v43, %v2412_v55  ;;  %v736_v44 = vsel %vm723_vm11, %v2406_v54, %v2411_v59  ;;  %v735_v14 = vsel %vm723_vm11, %v2412_v55, %v2417_v28  ;;  %v734_v46 = vsel %vm723_vm11, %v2411_v59, %v2416_v61 }
  0xd0   :  { %v3284_v63 = vpop.permute.xlu1 %2424  ;;  %v2131_v3 = vpack.c.bf16 %v737_v27, %v736_v44  ;;  %v3288_v13 = vpop.permute.xlu0 %2419 }
  0xd1   :  { %v4126_v7 = vunpack.i.h.bf16 %v3284_v63  ;;  %v2426_v12 = vunpack.i.l.bf16 %v3284_v63  ;;  %v2422_v11 = vunpack.i.h.bf16 %v3288_v13  ;;  %v2421_v21 = vunpack.i.l.bf16 %v3288_v13 }
  0xd2   :  { %2133 = vmatprep.subr.msk.bf16.mxu0 %vm3103_vm10, %v2131_v3  ;;  %vm3325_vm10 = vmpackc.low %vm290_vm1, %vm290_vm1 }
  0xd3   :  { %v738_v26 = vsel %vm723_vm11, %v2426_v12, %v2406_v54  ;;  %v739_v29 = vsel %vm723_vm11, %v4126_v7, %v2407_v43  ;;  %v733_v54 = vsel %vm723_vm11, %v2417_v28, %v2422_v11  ;;  %v732_v43 = vsel %vm723_vm11, %v2416_v61, %v2421_v21  ;;  %vm3374_vm1 = vmpackc.low %vm298_vm13, %vm298_vm13 }
  0xd4   :  { %v2134_v55 = vpack.c.bf16 %v739_v29, %v738_v26  ;;  %v2435_v60 = vpop.permute.xlu1 %2434  ;;  %v2181_v59 = vpack.c.bf16 %v733_v54, %v732_v43  ;;  %v2430_v3 = vpop.permute.xlu0 %2429  ;;  %v2184_v28 = vpack.c.bf16 %v735_v14, %v734_v46 }
  0xd5   :  { %v2437_v27 = vunpack.i.h.bf16 %v2435_v60  ;;  %v2436_v44 = vunpack.i.l.bf16 %v2435_v60  ;;  %v2432_v29 = vunpack.i.h.bf16 %v2430_v3  ;;  %v2431_v7 = vunpack.i.l.bf16 %v2430_v3 }
  0xd6   :  { %2136 = vmatpush1.bf16.msk.msra.mxu0 %vm3309_vm15, %v2134_v55  ;;  %2183 = vmatprep.subr.msk.bf16.mxu1 %vm3086_vm9, %v2181_v59  ;;  %vm3380_vm9 = vcmp.lt.s32.totalorder %v107_v36, 240 }
  0xd7   :  { %2138 = vmatprep.subr.bf16.mxu0 %v2137_v15  ;;  %v880_v61 = vsel %vm4144_vm6, %v2432_v29, %v2437_v27  ;;  %v879_v54 = vsel %vm4144_vm6, %v2431_v7, %v2436_v44  ;;  %2186 = vmatpush1.bf16.msk.msra.mxu1 %vm3325_vm10, %v2184_v28  ;;  %vm3415_vm13 = vmand %vm3380_vm9, %vm289_vm5 }
  0xd8   :  { %v3342_v14 = vpop.permute.xlu1 %2444  ;;  %v2141_v46 = vpack.c.bf16 %v880_v61, %v879_v54  ;;  %v2440_v43 = vpop.permute.xlu0 %2439  ;;  %2188 = vmatprep.subr.bf16.mxu1 %v2187_v17  ;;  %vm2148_vm5 = vmpackc.low %vm3415_vm13, %vm3415_vm13 }
  0xd9   :  { %v2447_v55 = vunpack.i.h.bf16 %v3342_v14  ;;  %v2446_v57 = vunpack.i.l.bf16 %v3342_v14  ;;  %v2442_v8 = vunpack.i.h.bf16 %v2440_v43  ;;  %v2441_v9 = vunpack.i.l.bf16 %v2440_v43  ;;  %vm2154_vm13 = vmpackc.low %vm3380_vm9, %vm3380_vm9 }
  0xda   :  { %2140 = vmatpush1.bf16.msra.mxu0 %v2139_v16 }
  0xdb   :  { %2143 = vmatprep.subr.msk.bf16.mxu0 %vm3214_vm14, %v2141_v46  ;;  %v876_v15 = vsel %vm4144_vm6, %v2442_v8, %v2447_v55  ;;  %v878_v60 = vsel %vm4144_vm6, %v2437_v27, %v2442_v8  ;;  %v875_v5 = vsel %vm4144_vm6, %v2441_v9, %v2446_v57  ;;  %v877_v2 = vsel %vm4144_vm6, %v2436_v44, %v2441_v9  ;;  %vm3401_vm14 = vmpackc.low %vm296_vm0, %vm296_vm0 }
  0xdc   :  { %2190 = vmatpush1.bf16.msra.mxu1 %v2189_v18  ;;  %v2455_v4 = vpop.permute.xlu1 %2454  ;;  %v2191_v6 = vpack.c.bf16 %v876_v15, %v875_v5  ;;  %v2194_v16 = vpack.c.bf16 %v878_v60, %v877_v2  ;;  %v3369_v17 = vpop.permute.xlu0 %2449  ;;  %vm4141_vm0 = vcmp.lt.s32.totalorder %v3019_v30, 113 }
  0xdd   :  { %v4135_v0 = vunpack.i.h.bf16 %v3369_v17  ;;  %v2451_v1 = vunpack.i.l.bf16 %v3369_v17  ;;  %v2457_v44 = vunpack.i.h.bf16 %v2455_v4  ;;  %v2456_v3 = vunpack.i.l.bf16 %v2455_v4 }
  0xde   :  { %2193 = vmatprep.subr.msk.bf16.mxu1 %vm3235_vm4, %v2191_v6  ;;  %vm3407_vm4 = vcmp.lt.s32.totalorder %v121_v35, 240 }
  0xdf   :  { %v881_v18 = vsel %vm4144_vm6, %v2451_v1, %v2431_v7  ;;  %v882_v33 = vsel %vm4144_vm6, %v4135_v0, %v2432_v29  ;;  %vm3435_vm2 = vmand %vm3407_vm4, %vm291_vm3 }
  0xe0   :  { %2196 = vmatpush1.bf16.msk.msra.mxu1 %vm3374_vm1, %v2194_v16  ;;  %v2465_v36 = vpop.permute.xlu1 %2464  ;;  %v2144_v42 = vpack.c.bf16 %v882_v33, %v881_v18  ;;  %v2460_v27 = vpop.permute.xlu0 %2459  ;;  %vm2198_vm3 = vmpackc.low %vm3435_vm2, %vm3435_vm2  ;;  %vm4184_vm2 = vcmp.le.s32.totalorder %v3046_v39, 14 }
  0xe1   :  { %v2462_v28 = vunpack.i.h.bf16 %v2460_v27  ;;  %v2461_v32 = vunpack.i.l.bf16 %v2460_v27  ;;  %v2467_v35 = vunpack.i.h.bf16 %v2465_v36  ;;  %v2466_v29 = vunpack.i.l.bf16 %v2465_v36 }
  0xe2   :  { %2146 = vmatpush1.bf16.msk.msra.mxu0 %vm3401_vm14, %v2144_v42 }
  0xe3   :  { %v993_v61 = vsel %vm4141_vm0, %v2457_v44, %v2462_v28  ;;  %v992_v54 = vsel %vm4141_vm0, %v2456_v3, %v2461_v32  ;;  %v991_v4 = vsel %vm4141_vm0, %v2462_v28, %v2467_v35  ;;  %v990_v6 = vsel %vm4141_vm0, %v2461_v32, %v2466_v29 }
  0xe4   :  { %v3429_v46 = vpop.permute.xlu1 %2474  ;;  %v2147_v8 = vpack.c.bf16 %v993_v61, %v992_v54  ;;  %v3441_v60 = vpop.permute.xlu0 %2469  ;;  %v2200_v32 = vpack.c.bf16 %v991_v4, %v990_v6 }
  0xe5   :  { %v4131_v9 = vunpack.i.h.bf16 %v3429_v46  ;;  %v4132_v15 = vunpack.i.l.bf16 %v3429_v46  ;;  %v4133_v5 = vunpack.i.h.bf16 %v3441_v60  ;;  %v4134_v2 = vunpack.i.l.bf16 %v3441_v60 }
  0xe6   :  { %2149 = vmatprep.subr.msk.bf16.mxu0 %vm2148_vm5, %v2147_v8  ;;  %vm3526_vm5 = vmand %vm3380_vm9, %vm297_vm12 }
  0xe7   :  { %v994_v16 = vsel %vm4141_vm0, %v4132_v15, %v2456_v3  ;;  %v995_v18 = vsel %vm4141_vm0, %v4131_v9, %v2457_v44  ;;  %v989_v36 = vsel %vm4141_vm0, %v2467_v35, %v4133_v5  ;;  %v988_v7 = vsel %vm4141_vm0, %v2466_v29, %v4134_v2  ;;  %vm2159_vm12 = vmpackc.low %vm3526_vm5, %vm3526_vm5 }
  0xe8   :  { %v2150_v33 = vpack.c.bf16 %v995_v18, %v994_v16  ;;  %v2485_v42 = vpop.permute.xlu1 %2484  ;;  %v2197_v27 = vpack.c.bf16 %v989_v36, %v988_v7  ;;  %v2480_v28 = vpop.permute.xlu0 %2479  ;;  %v92_v35 = vadd.s32 512, %v3019_v30  ;;  %v3486_v36 = vadd.s32 640, %v3019_v30 }
  0xe9   :  { %v2487_v3 = vunpack.i.h.bf16 %v2485_v42  ;;  %v2486_v44 = vunpack.i.l.bf16 %v2485_v42  ;;  %v2482_v61 = vunpack.i.h.bf16 %v2480_v28  ;;  %v2481_v54 = vunpack.i.l.bf16 %v2480_v28 }
  0xea   :  { %2152 = vmatpush1.bf16.msk.msra.mxu0 %vm3309_vm15, %v2150_v33  ;;  %2199 = vmatprep.subr.msk.bf16.mxu1 %vm2198_vm3, %v2197_v27  ;;  %v128_v26 = vand.u32 255, %v92_v35  ;;  %vm2204_vm15 = vmpackc.low %vm3407_vm4, %vm3407_vm4 }
  0xeb   :  { %v1114_v43 = vsel %vm4140_vm7, %v2482_v61, %v2487_v3  ;;  %v1113_v29 = vsel %vm4140_vm7, %v2481_v54, %v2486_v44  ;;  %2202 = vmatpush1.bf16.msk.msra.mxu1 %vm3325_vm10, %v2200_v32  ;;  %vm4139_vm10 = vcmp.lt.s32.totalorder %v3019_v30, 111  ;;  %vm3556_vm3 = vmand %vm3407_vm4, %vm4184_vm2 }
  0xec   :  { %v3478_v8 = vpop.permute.xlu1 %2494  ;;  %v2153_v31 = vpack.c.bf16 %v1114_v43, %v1113_v29  ;;  %v2490_v16 = vpop.permute.xlu0 %2489  ;;  %vm2209_vm4 = vmpackc.low %vm3556_vm3, %vm3556_vm3 }
  0xed   :  { %v4128_v4 = vunpack.i.h.bf16 %v3478_v8  ;;  %v4127_v6 = vunpack.i.l.bf16 %v3478_v8  ;;  %v2492_v18 = vunpack.i.h.bf16 %v2490_v16  ;;  %v2491_v33 = vunpack.i.l.bf16 %v2490_v16 }
  0xee   :  { %2155 = vmatprep.subr.msk.bf16.mxu0 %vm2154_vm13, %v2153_v31  ;;  %v3506_v31 = vadd.s32 768, %v3019_v30  ;;  %vm3563_vm13 = vcmp.ge.s32.totalorder %v128_v26, 16 }
  0xef   :  { %v1110_v7 = vsel %vm4140_vm7, %v2492_v18, %v4128_v4  ;;  %v1109_v42 = vsel %vm4140_vm7, %v2491_v33, %v4127_v6  ;;  %v1111_v28 = vsel %vm4140_vm7, %v2486_v44, %v2491_v33  ;;  %v1112_v32 = vsel %vm4140_vm7, %v2487_v3, %v2492_v18 }
  0xf0   :  { %v2505_v27 = vpop.permute.xlu1 %2504  ;;  %v2203_v35 = vpack.c.bf16 %v1110_v7, %v1109_v42  ;;  %v3503_v43 = vpop.permute.xlu0 %2499  ;;  %v2206_v29 = vpack.c.bf16 %v1112_v32, %v1111_v28  ;;  %v135_v18 = vand.u32 255, %v3486_v36  ;;  %v3519_v33 = vand.u32 15, %v128_v26 }
  0xf1   :  { %v4129_v16 = vunpack.i.h.bf16 %v3503_v43  ;;  %v4130_v6 = vunpack.i.l.bf16 %v3503_v43  ;;  %v2507_v32 = vunpack.i.h.bf16 %v2505_v27 }
  0xf2   :  { %2205 = vmatprep.subr.msk.bf16.mxu1 %vm2204_vm15, %v2203_v35  ;;  %v2506_v35 = vunpack.i.l.bf16 %v2505_v27  ;;  %v3545_v27 = vand.u32 15, %v135_v18  ;;  %vm292_vm9 = vcmp.ge.s32.totalorder %v3519_v33, 1 }
  0xf3   :  { %2207 = vmatpush1.bf16.msra.mxu1 %v2206_v29  ;;  %v1115_v44 = vsel %vm4140_vm7, %v4130_v6, %v2481_v54  ;;  %v1116_v3 = vsel %vm4140_vm7, %v4129_v16, %v2482_v61  ;;  %v3531_v54 = vadd.s32 896, %v3019_v30  ;;  %v142_v61 = vand.u32 255, %v3506_v31  ;;  %vm3610_vm5 = vmand %vm3563_vm13, %vm292_vm9 }
  0xf4   :  { %v2515_v4 = vpop.permute.xlu1 %2514  ;;  %v2510_v7 = vpop.permute.xlu0 %2509  ;;  %v2156_v42 = vpack.c.bf16 %v1116_v3, %v1115_v44  ;;  %vm4142_vm15 = vcmp.ge.s32.totalorder %v3545_v27, 1 }
  0xf5   :  { %v2512_v29 = vunpack.i.h.bf16 %v2510_v7  ;;  %v2511_v16 = vunpack.i.l.bf16 %v2510_v7  ;;  %v2517_v6 = vunpack.i.h.bf16 %v2515_v4  ;;  %v2516_v9 = vunpack.i.l.bf16 %v2515_v4 }
  0xf6   :  { %2157 = vmatpush1.bf16.msra.mxu0 %v2156_v42  ;;  %v149_v15 = vand.u32 255, %v3531_v54  ;;  %v3567_v2 = vand.u32 15, %v142_v61  ;;  %vm3615_vm2 = vcmp.ge.s32.totalorder %v142_v61, 16  ;;  %v3662_v42 = vld [vmem:[#allocation9 + $0x28] sm:$0xff] }
  0xf7   :  { %v1227_v41 = vsel %vm4139_vm10, %v2507_v32, %v2512_v29  ;;  %v1226_v59 = vsel %vm4139_vm10, %v2506_v35, %v2511_v16  ;;  %v1225_v39 = vsel %vm4139_vm10, %v2512_v29, %v2517_v6  ;;  %v1224_v62 = vsel %vm4139_vm10, %v2511_v16, %v2516_v9 }
  0xf8   :  { %v3538_v44 = vpop.permute.xlu1 %2524  ;;  %v2158_v4 = vpack.c.bf16 %v1227_v41, %v1226_v59  ;;  %v3550_v7 = vpop.permute.xlu0 %2519 }
  0xf9   :  { %v4137_v31 = vunpack.i.h.bf16 %v3538_v44  ;;  %v4136_v3 = vunpack.i.l.bf16 %v3538_v44  ;;  %v4138_v5 = vunpack.i.h.bf16 %v3550_v7  ;;  %v2521_v41 = vunpack.i.l.bf16 %v3550_v7 }
  0xfa   :  { %2160 = vmatprep.subr.msk.bf16.mxu0 %vm2159_vm12, %v2158_v4  ;;  %vm294_vm12 = vcmp.ge.s32.totalorder %v3567_v2, 1 }
  0xfb   :  { %v1228_v0 = vsel %vm4139_vm10, %v4136_v3, %v2506_v35  ;;  %v1229_v26 = vsel %vm4139_vm10, %v4137_v31, %v2507_v32  ;;  %v1223_v16 = vsel %vm4139_vm10, %v2517_v6, %v4138_v5  ;;  %v1222_v35 = vsel %vm4139_vm10, %v2516_v9, %v2521_v41  ;;  %v3604_v9 = vld [vmem:[#allocation9] sm:$0xff] }
  0xfc   :  { %v2161_v29 = vpack.c.bf16 %v1229_v26, %v1228_v0  ;;  %v2535_v3 = vpop.permute.xlu1 %2534  ;;  %v2208_v28 = vpack.c.bf16 %v1223_v16, %v1222_v35  ;;  %v2530_v4 = vpop.permute.xlu0 %2529  ;;  %v3600_v26 = vand.u32 15, %v149_v15  ;;  %v2211_v6 = vpack.c.bf16 %v1225_v39, %v1224_v62  ;;  %v3619_v39 = vld [vmem:[#allocation9 + $0x18] sm:$0xff] }
  0xfd   :  { %v2537_v32 = vunpack.i.h.bf16 %v2535_v3  ;;  %v2536_v0 = vunpack.i.l.bf16 %v2535_v3  ;;  %v2532_v31 = vunpack.i.h.bf16 %v2530_v4  ;;  %v2531_v5 = vunpack.i.l.bf16 %v2530_v4  ;;  %v3657_v4 = vld [vmem:[#allocation9 + $0x10] sm:$0xff] }
  0xfe   :  { %2163 = vmatpush1.bf16.msk.msra.mxu0 %vm3401_vm14, %v2161_v29  ;;  %2210 = vmatprep.subr.msk.bf16.mxu1 %vm2209_vm4, %v2208_v28  ;;  %vm4193_vm14 = vcmp.lt.s32.totalorder %v3019_v30, 17  ;;  %v4285_v35 = vunpack.i.h.bf16 %v3550_v7 }
  0xff   :  { %v374_v38 = vsel %vm4193_vm14, %v2532_v31, %v2537_v32  ;;  %vm4194_vm3 = vmmov %vm4193_vm14  ;;  %2213 = vmatpush1.bf16.msk.msra.mxu1 %vm3374_vm1, %v2211_v6 }
 0x100   :  { %v376_v62 = vsel %vm4194_vm3, %v2347_v49, %v2532_v31  ;;  %vm4195_vm10 = vmmov %vm4194_vm3  ;;  %v2545_v16 = vpop.permute.xlu1 %2544  ;;  %v2540_v28 = vpop.permute.xlu0 %2539 }
 0x101   :  { %v373_v29 = vsel %vm4195_vm10, %v2531_v5, %v2536_v0  ;;  %vm4196_vm4 = vmmov %vm4194_vm3  ;;  %1531 = vmatmul.mubr.f32.vlgmr.msra.gmra.mrb[0].mxu0 %v3604_v9  ;;  %vm4143_vm3 = vcmp.ge.s32.totalorder %v3600_v26, 1  ;;  %v2546_v45 = vunpack.i.l.bf16 %v2545_v16  ;;  %v2541_v37 = vunpack.i.l.bf16 %v2540_v28 }
 0x102   :  { %v375_v61 = vsel %vm4196_vm4, %v2346_v50, %v2531_v5  ;;  %vm3638_vm14 = vmpackc.low %vm4142_vm15, %vm4142_vm15  ;;  %v2214_v49 = vpack.c.bf16 %v374_v38, %v373_v29  ;;  %v2542_v50 = vunpack.i.h.bf16 %v2540_v28  ;;  %vm4201_vm4 = vcmask 130048   ;;  %1614 = vmatmul.mubr.f32.vlgmr.msra.gmra.mrb[0].mxu1 %v3604_v9 }
 0x103   :  { %v2217_v31 = vpack.c.bf16 %v376_v62, %v375_v61  ;;  %vm2218_vm10 = vmpackc.low %vm3610_vm5, %vm3610_vm5  ;;  %1975 = vmatprep.mubr.msk.f32.mxu0 %vm4201_vm4, %v3619_v39  ;;  %v2547_v6 = vunpack.i.h.bf16 %v2545_v16  ;;  %vm4202_vm5 = vcmp.lt.s32.totalorder %v3019_v30, 17 }
 0x104   :  { %vm3651_vm1 = vmand %vm3615_vm2, %vm294_vm12  ;;  %2216 = vmatprep.subr.msk.bf16.mxu0 %vm3638_vm14, %v2214_v49  ;;  %v372_v38 = vsel %vm4202_vm5, %v2537_v32, %v2542_v50  ;;  %v2555_v61 = vpop.permute.xlu1 %2554  ;;  %v2550_v28 = vpop.permute.xlu0 %2549 }
 0x105   :  { %vm4203_vm7 = vmmov %vm4202_vm5  ;;  %2219 = vmatpush1.bf16.msk.msra.mxu0 %vm2218_vm10, %v2217_v31  ;;  %v2557_v49 = vunpack.i.h.bf16 %v2555_v61  ;;  %v2556_v10 = vunpack.i.l.bf16 %v2555_v61  ;;  %vm4208_vm10 = vcmask 130048  }
 0x106   :  { %v369_v62 = vsel %vm4203_vm7, %v2541_v37, %v2351_v20  ;;  %vm4204_vm4 = vmmov %vm4202_vm5  ;;  %vm4145_vm5 = vcmp.le.s32.totalorder %v3545_v27, 14  ;;  %1978 = vmatprep.mubr.msk.f32.mxu1 %vm4208_vm10, %v3619_v39  ;;  %1537 = vmatmul.mubr.f32.gmra.mrb[2].mxu0 %v3657_v4 }
 0x107   :  { %v370_v29 = vsel %vm4204_vm4, %v2542_v50, %v2352_v19  ;;  %vm3677_vm0 = vmpackc.low %vm4143_vm3, %vm4143_vm3  ;;  %v2551_v50 = vunpack.i.l.bf16 %v2550_v28  ;;  %1620 = vmatmul.mubr.f32.gmra.mrb[2].mxu1 %v3657_v4 }
 0x108   :  { %vm4207_vm15 = vmmov %vm4204_vm4  ;;  %v2264_v20 = vpack.c.bf16 %v370_v29, %v369_v62  ;;  %vm4209_vm4 = vcmp.lt.s32.totalorder %v3019_v30, 16  ;;  %v2565_v40 = vpop.permute.xlu1 %2564 }
 0x109   :  { %v371_v32 = vsel %vm4207_vm15, %v2536_v0, %v2541_v37  ;;  %vm2268_vm7 = vmpackc.low %vm3651_vm1, %vm3651_vm1  ;;  %v496_v19 = vsel %vm4209_vm4, %v2371_v58, %v2546_v45  ;;  %v2552_v0 = vunpack.i.h.bf16 %v2550_v28  ;;  %v3696_v37 = vld [vmem:[#allocation9 + $0x20] sm:$0xff]  ;;  %v2567_v61 = vunpack.i.h.bf16 %v2565_v40 }
 0x10a   :  { %v2267_v31 = vpack.c.bf16 %v372_v38, %v371_v32  ;;  %vm4210_vm15 = vmmov %vm4208_vm10  ;;  %2266 = vmatprep.subr.msk.bf16.mxu1 %vm3677_vm0, %v2264_v20  ;;  %v2566_v32 = vunpack.i.l.bf16 %v2565_v40  ;;  %v2560_v20 = vpop.permute.xlu0 %2559 }
 0x10b   :  { %1976 = vmatprep.mubr.msk.f32.mxu0 %vm4210_vm15, %v3662_v42  ;;  %vm4211_vm3 = vmmov %vm4209_vm4  ;;  %vm300_vm15 = vcmp.le.s32.totalorder %v3519_v33, 14  ;;  %v2561_v5 = vunpack.i.l.bf16 %v2560_v20 }
 0x10c   :  { %v497_v62 = vsel %vm4211_vm3, %v2372_v56, %v2547_v6  ;;  %vm4212_vm10 = vmmov %vm4211_vm3  ;;  %v492_v56 = vsel %vm4211_vm3, %v2551_v50, %v2556_v10  ;;  %2269 = vmatpush1.bf16.msk.msra.mxu1 %vm2268_vm7, %v2267_v31  ;;  %vm4217_vm7 = vcmask 130048   ;;  %1543 = vmatmul.mubr.f32.gmra.mrb[4].mxu0 %v3696_v37 }
 0x10d   :  { %v490_v58 = vsel %vm4212_vm10, %v2556_v10, %v2376_v51  ;;  %vm4213_vm4 = vmmov %vm4211_vm3  ;;  %1979 = vmatprep.mubr.msk.f32.mxu1 %vm4217_vm7, %v3662_v42  ;;  %v2222_v28 = vpack.c.bf16 %v497_v62, %v496_v19  ;;  %v609_v19 = vsel %vm602_vm8, %v2396_v53, %v2561_v5  ;;  %v2575_v62 = vpop.permute.xlu1 %2574 }
 0x10e   :  { %v491_v38 = vsel %vm4213_vm4, %v2557_v49, %v2377_v48  ;;  %vm4214_vm6 = vmmov %vm4211_vm3  ;;  %1626 = vmatmul.mubr.f32.gmra.mrb[4].mxu1 %v3696_v37  ;;  %v2577_v34 = vunpack.i.h.bf16 %v2575_v62  ;;  %v2570_v53 = vpop.permute.xlu0 %2569 }
 0x10f   :  { %v493_v52 = vsel %vm4214_vm6, %v2552_v0, %v2557_v49  ;;  %vm4215_vm10 = vmmov %vm4211_vm3  ;;  %v2571_v40 = vunpack.i.l.bf16 %v2570_v53 }
 0x110   :  { %v494_v48 = vsel %vm4215_vm10, %v2546_v45, %v2551_v50  ;;  %vm4216_vm4 = vmmov %vm4211_vm3  ;;  %v2272_v29 = vpack.c.bf16 %v493_v52, %v492_v56  ;;  %v2562_v45 = vunpack.i.h.bf16 %v2560_v20  ;;  %v607_v50 = vsel %vm602_vm8, %v2561_v5, %v2566_v32 }
 0x111   :  { %v495_v51 = vsel %vm4216_vm4, %v2547_v6, %v2552_v0  ;;  %vm2223_vm6 = vmpackc.low %vm3563_vm13, %vm3563_vm13  ;;  %v2270_v6 = vpack.c.bf16 %v491_v38, %v490_v58  ;;  %vm303_vm4 = vcmp.le.s32.totalorder %v3600_v26, 14  ;;  %v2572_v56 = vunpack.i.h.bf16 %v2570_v53 }
 0x112   :  { %v2220_v49 = vpack.c.bf16 %v495_v51, %v494_v48  ;;  %vm2273_vm1 = vmpackc.low %vm3615_vm2, %vm3615_vm2  ;;  %v608_v31 = vsel %vm602_vm8, %v2562_v45, %v2567_v61  ;;  %v610_v0 = vsel %vm602_vm8, %v2397_v47, %v2562_v45  ;;  %v2576_v47 = vunpack.i.l.bf16 %v2575_v62 }
 0x113   :  { %vm3740_vm3 = vmand %vm3563_vm13, %vm300_vm15  ;;  %2271 = vmatprep.subr.bf16.mxu1 %v2270_v6  ;;  %v2225_v38 = vpack.c.bf16 %v608_v31, %v607_v50  ;;  %v2228_v52 = vpack.c.bf16 %v610_v0, %v609_v19  ;;  %v731_v51 = vsel %vm723_vm11, %v2422_v11, %v2577_v34  ;;  %v604_v13 = vsel %vm602_vm8, %v2572_v56, %v2402_v25  ;;  %v2731_v31 = vld [vmem:[#allocation7 + $0x28] sm:$0xff] }
 0x114   :  { %vm4220_vm10 = vmmov %vm4217_vm7  ;;  %2221 = vmatprep.subr.bf16.mxu0 %v2220_v49  ;;  %vm302_vm7 = vcmp.le.s32.totalorder %v3567_v2, 14  ;;  %2274 = vmatpush1.bf16.msk.msra.mxu1 %vm2273_vm1, %v2272_v29  ;;  %v730_v48 = vsel %vm723_vm11, %v2421_v21, %v2576_v47  ;;  %v606_v29 = vsel %vm602_vm8, %v2567_v61, %v2572_v56  ;;  %v2585_v21 = vpop.permute.xlu1 %2584  ;;  %v605_v61 = vsel %vm602_vm8, %v2566_v32, %v2571_v40 }
 0x115   :  { %1980 = vmatprep.mubr.msk.f32.mxu0 %vm4220_vm10, %v2993_v24  ;;  %vm3764_vm10 = vmpackc.low %vm4145_vm5, %vm4145_vm5  ;;  %2224 = vmatpush1.bf16.msk.msra.mxu0 %vm2223_vm6, %v2222_v28  ;;  %vm4225_vm6 = vcmask 130048   ;;  %v2234_v3 = vpack.c.bf16 %v731_v51, %v730_v48  ;;  %v2587_v23 = vunpack.i.h.bf16 %v2585_v21  ;;  %v2586_v25 = vunpack.i.l.bf16 %v2585_v21  ;;  %v2730_v28 = vld [vmem:[#allocation4 + $0x28] sm:$0xff] }
 0x116   :  { %vm2229_vm5 = vmpackc.low %vm3740_vm3, %vm3740_vm3  ;;  %1983 = vmatprep.mubr.msk.f32.mxu1 %vm4225_vm6, %v2993_v24  ;;  %2227 = vmatprep.subr.msk.bf16.mxu0 %vm3764_vm10, %v2225_v38  ;;  %v603_v24 = vsel %vm602_vm8, %v2571_v40, %v2401_v22  ;;  %v2580_v22 = vpop.permute.xlu0 %2579  ;;  %v2278_v49 = vpack.c.bf16 %v606_v29, %v605_v61  ;;  %v4228_v6 = vunpack.i.h.bf16 %v3284_v63  ;;  %v2237_v0 = vpack.c.bf16 %v2731_v31, %v2730_v28  ;;  %v2732_v29 = vld [vmem:[#allocation4 + $0x38] sm:$0xff] }
 0x117   :  { %vm3785_vm13 = vmand %vm3615_vm2, %vm302_vm7  ;;  %v2275_v20 = vpack.c.bf16 %v604_v13, %v603_v24  ;;  %v2582_v45 = vunpack.i.h.bf16 %v2580_v22  ;;  %v2581_v5 = vunpack.i.l.bf16 %v2580_v22  ;;  %v724_v32 = vsel %vm723_vm11, %v2586_v25, %v2426_v12  ;;  %v2733_v24 = vld [vmem:[#allocation7 + $0x38] sm:$0xff]  ;;  %v2736_v22 = vld [vmem:[#allocation4 + $0x30] sm:$0xff] }
 0x118   :  { %vm3814_vm2 = vmpackc.low %vm303_vm4, %vm303_vm4  ;;  %v725_v10 = vsel %vm723_vm11, %v2587_v23, %v4228_v6  ;;  %v2595_v63 = vpop.permute.xlu1 %2594  ;;  %v2287_v13 = vpack.c.bf16 %v2733_v24, %v2732_v29  ;;  %v4255_v2 = vunpack.i.l.bf16 %v3441_v60  ;;  %v4259_v58 = vunpack.i.l.bf16 %v3429_v46 }
 0x119   :  { %2230 = vmatpush1.bf16.msk.msra.mxu0 %vm2229_vm5, %v2228_v52  ;;  %vm2279_vm1 = vmpackc.low %vm3785_vm13, %vm3785_vm13  ;;  %2277 = vmatprep.subr.msk.bf16.mxu1 %vm3814_vm2, %v2275_v20  ;;  %v2281_v50 = vpack.c.bf16 %v725_v10, %v724_v32  ;;  %v727_v19 = vsel %vm723_vm11, %v2582_v45, %v2587_v23  ;;  %v729_v62 = vsel %vm723_vm11, %v2577_v34, %v2582_v45  ;;  %v2597_v53 = vunpack.i.h.bf16 %v2595_v63  ;;  %v2734_v20 = vld [vmem:[#allocation4 + $0x20] sm:$0xff] }
 0x11a   :  { %v726_v12 = vsel %vm723_vm11, %v2581_v5, %v2586_v25  ;;  %2280 = vmatpush1.bf16.msk.msra.mxu1 %vm2279_vm1, %v2278_v49  ;;  %v728_v38 = vsel %vm723_vm11, %v2576_v47, %v2581_v5  ;;  %v2596_v56 = vunpack.i.l.bf16 %v2595_v63  ;;  %v2590_v40 = vpop.permute.xlu0 %2589  ;;  %vm3849_vm8 = vmpackc.low %vm292_vm9, %vm292_vm9  ;;  %vm4233_vm9 = vcmp.lt.s32.totalorder %v3019_v30, 127  ;;  %v2735_v23 = vld [vmem:[#allocation7 + $0x20] sm:$0xff]  ;;  %v2737_v49 = vld [vmem:[#allocation7 + $0x30] sm:$0xff] }
 0x11b   :  { %v2284_v52 = vpack.c.bf16 %v727_v19, %v726_v12  ;;  %v2231_v34 = vpack.c.bf16 %v729_v62, %v728_v38  ;;  %v2592_v48 = vunpack.i.h.bf16 %v2590_v40  ;;  %v2591_v51 = vunpack.i.l.bf16 %v2590_v40  ;;  %2283 = vmatprep.subr.msk.bf16.mxu1 %vm3677_vm0, %v2281_v50  ;;  %vm3858_vm11 = vmpackc.low %vm294_vm12, %vm294_vm12 }
 0x11c   :  { %vm4234_vm5 = vmmov %vm4233_vm9  ;;  %v2605_v61 = vpop.permute.xlu1 %2604  ;;  %v2239_v25 = vpack.c.bf16 %v2735_v23, %v2734_v20  ;;  %v2289_v45 = vpack.c.bf16 %v2737_v49, %v2736_v22  ;;  %vm3895_vm13 = vcmp.lt.s32.totalorder %v135_v18, 240  ;;  %v4249_v18 = vunpack.i.h.bf16 %v3369_v17 }
 0x11d   :  { %v874_v21 = vsel %vm4233_vm9, %v2447_v55, %v2592_v48  ;;  %v873_v16 = vsel %vm4234_vm5, %v2446_v57, %v2591_v51  ;;  %2233 = vmatprep.subr.msk.bf16.mxu0 %vm3638_vm14, %v2231_v34  ;;  %vm4235_vm0 = vmmov %vm4234_vm5  ;;  %vm3882_vm14 = vcmp.lt.s32.totalorder %v149_v15, 240  ;;  %v2607_v10 = vunpack.i.h.bf16 %v2605_v61 }
 0x11e   :  { %v872_v5 = vsel %vm4235_vm0, %v2592_v48, %v2597_v53  ;;  %vm4236_vm12 = vmmov %vm4235_vm0  ;;  %v2244_v14 = vpack.c.bf16 %v874_v21, %v873_v16  ;;  %2236 = vmatpush1.bf16.msk.msra.mxu0 %vm3849_vm8, %v2234_v3  ;;  %2286 = vmatpush1.bf16.msk.msra.mxu1 %vm3858_vm11, %v2284_v52  ;;  %v2600_v57 = vpop.permute.xlu0 %2599  ;;  %v2606_v28 = vunpack.i.l.bf16 %v2605_v61  ;;  %vm4246_vm9 = vcmp.ge.s32.totalorder %v3600_v26, 1 }
 0x11f   :  { %v871_v55 = vsel %vm4236_vm12, %v2591_v51, %v2596_v56  ;;  %v2602_v32 = vunpack.i.h.bf16 %v2600_v57  ;;  %v2601_v6 = vunpack.i.l.bf16 %v2600_v57  ;;  %2238 = vmatprep.subr.bf16.mxu0 %v2237_v0  ;;  %2288 = vmatprep.subr.bf16.mxu1 %v2287_v13  ;;  %vm3889_vm3 = vmpackc.low %vm300_vm15, %vm300_vm15  ;;  %v4257_v34 = vunpack.i.h.bf16 %v3441_v60 }
 0x120   :  { %v2241_v54 = vpack.c.bf16 %v872_v5, %v871_v55  ;;  %vm4243_vm6 = vmmov %vm4235_vm0  ;;  %v2615_v50 = vpop.permute.xlu1 %2614  ;;  %v4261_v29 = vunpack.i.h.bf16 %v3429_v46  ;;  %v4289_v15 = vunpack.i.h.bf16 %v3538_v44 }
 0x121   :  { %v870_v31 = vsel %vm4243_vm6, %v2597_v53, %v2602_v32  ;;  %vm4244_vm1 = vmmov %vm4235_vm0  ;;  %v884_v19 = vsel %vm4235_vm0, %v2602_v32, %v4249_v18  ;;  %v2617_v12 = vunpack.i.h.bf16 %v2615_v50  ;;  %v2616_v63 = vunpack.i.l.bf16 %v2615_v50 }
 0x122   :  { %v869_v0 = vsel %vm4244_vm1, %v2596_v56, %v2601_v6  ;;  %vm4245_vm15 = vmmov %vm4235_vm0  ;;  %2240 = vmatpush1.bf16.msra.mxu0 %v2239_v25  ;;  %2290 = vmatpush1.bf16.msra.mxu1 %v2289_v45  ;;  %vm4252_vm6 = vcmp.ge.s32.totalorder %v3545_v27, 1 }
 0x123   :  { %v883_v33 = vsel %vm4245_vm15, %v2601_v6, %v2451_v1  ;;  %vm3911_vm5 = vmand %vm3882_vm14, %vm4246_vm9  ;;  %v2294_v62 = vpack.c.bf16 %v870_v31, %v869_v0  ;;  %v2610_v1 = vpop.permute.xlu0 %2609  ;;  %2243 = vmatprep.subr.msk.bf16.mxu0 %vm3764_vm10, %v2241_v54  ;;  %v4271_v6 = vunpack.i.l.bf16 %v3478_v8 }
 0x124   :  { %vm3922_vm12 = vmpackc.low %vm302_vm7, %vm302_vm7  ;;  %v2291_v52 = vpack.c.bf16 %v884_v19, %v883_v33  ;;  %v2612_v53 = vunpack.i.h.bf16 %v2610_v1  ;;  %v2611_v56 = vunpack.i.l.bf16 %v2610_v1  ;;  %vm4256_vm7 = vcmp.lt.s32.totalorder %v3019_v30, 113  ;;  %v2625_v46 = vpop.permute.xlu1 %2624 }
 0x125   :  { %vm3932_vm1 = vmand %vm3895_vm13, %vm4252_vm6  ;;  %v986_v40 = vsel %vm4256_vm7, %v4255_v2, %v2606_v28  ;;  %v2627_v23 = vunpack.i.h.bf16 %v2625_v46  ;;  %v2626_v25 = vunpack.i.l.bf16 %v2625_v46 }
 0x126   :  { %vm4258_vm15 = vmmov %vm4256_vm7  ;;  %2293 = vmatprep.subr.msk.bf16.mxu1 %vm3814_vm2, %v2291_v52  ;;  %2246 = vmatpush1.bf16.msk.msra.mxu0 %vm3889_vm3, %v2244_v14  ;;  %vm4267_vm2 = vcmp.lt.s32.totalorder %v3019_v30, 112  ;;  %v4268_v14 = vunpack.i.h.bf16 %v3478_v8 }
 0x127   :  { %v987_v48 = vsel %vm4258_vm15, %v4257_v34, %v2607_v10  ;;  %vm4260_vm10 = vmmov %vm4256_vm7  ;;  %2296 = vmatpush1.bf16.msk.msra.mxu1 %vm3922_vm12, %v2294_v62  ;;  %v2620_v22 = vpop.permute.xlu0 %2619  ;;  %v4275_v62 = vunpack.i.l.bf16 %v3503_v43 }
 0x128   :  { %v996_v51 = vsel %vm4260_vm10, %v2616_v63, %v4259_v58  ;;  %vm4262_vm9 = vmmov %vm4256_vm7  ;;  %v2622_v49 = vunpack.i.h.bf16 %v2620_v22  ;;  %v2621_v45 = vunpack.i.l.bf16 %v2620_v22  ;;  %v2250_v5 = vpack.c.bf16 %v987_v48, %v986_v40 }
 0x129   :  { %v997_v24 = vsel %vm4262_vm9, %v2617_v12, %v4261_v29  ;;  %vm2298_vm0 = vmpackc.low %vm3911_vm5, %vm3911_vm5  ;;  %v4287_v58 = vunpack.i.l.bf16 %v3538_v44 }
 0x12a   :  { %v2297_v13 = vpack.c.bf16 %v997_v24, %v996_v51  ;;  %vm4263_vm6 = vmmov %vm4256_vm7  ;;  %v1106_v55 = vsel %vm4267_vm2, %v2622_v49, %v2627_v23 }
 0x12b   :  { %v983_v60 = vsel %vm4263_vm6, %v2612_v53, %v2617_v12  ;;  %vm4264_vm7 = vmmov %vm4263_vm6  ;;  %v2630_v0 = vpop.permute.xlu0 %2629 }
 0x12c   :  { %v985_v21 = vsel %vm4264_vm7, %v2607_v10, %v2612_v53  ;;  %vm4265_vm15 = vmmov %vm4263_vm6  ;;  %2299 = vmatprep.subr.msk.bf16.mxu1 %vm2298_vm0, %v2297_v13  ;;  %v2632_v33 = vunpack.i.h.bf16 %v2630_v0  ;;  %v2631_v8 = vunpack.i.l.bf16 %v2630_v0 }
 0x12d   :  { %v982_v16 = vsel %vm4265_vm15, %v2611_v56, %v2616_v63  ;;  %vm4266_vm10 = vmmov %vm4263_vm6  ;;  %v4279_v63 = vunpack.i.h.bf16 %v3503_v43 }
 0x12e   :  { %v984_v61 = vsel %vm4266_vm10, %v2606_v28, %v2611_v56  ;;  %v2300_v20 = vpack.c.bf16 %v983_v60, %v982_v16  ;;  %vm2248_vm9 = vmpackc.low %vm3932_vm1, %vm3932_vm1  ;;  %v2635_v28 = vpop.permute.xlu1 %2634 }
 0x12f   :  { %v2247_v11 = vpack.c.bf16 %v985_v21, %v984_v61  ;;  %vm4269_vm6 = vmmov %vm4267_vm2  ;;  %v2637_v50 = vunpack.i.h.bf16 %v2635_v28  ;;  %v2636_v36 = vunpack.i.l.bf16 %v2635_v28  ;;  %v2640_v17 = vpop.permute.xlu0 %2639 }
 0x130   :  { %v1108_v57 = vsel %vm4269_vm6, %v4268_v14, %v2622_v49  ;;  %vm4270_vm1 = vmmov %vm4267_vm2  ;;  %2302 = vmatpush1.bf16.msk.msra.mxu1 %vm3858_vm11, %v2300_v20  ;;  %v2642_v2 = vunpack.i.h.bf16 %v2640_v17  ;;  %v2641_v40 = vunpack.i.l.bf16 %v2640_v17  ;;  %vm4284_vm6 = vcmp.lt.s32.totalorder %v3019_v30, 111 }
 0x131   :  { %v1105_v32 = vsel %vm4270_vm1, %v2621_v45, %v2626_v25  ;;  %vm4272_vm7 = vmmov %vm4270_vm1  ;;  %2249 = vmatprep.subr.msk.bf16.mxu0 %vm2248_vm9, %v2247_v11  ;;  %v1220_v34 = vsel %vm4284_vm6, %v2521_v41, %v2636_v36 }
 0x132   :  { %v1107_v10 = vsel %vm4272_vm7, %v4271_v6, %v2621_v45  ;;  %vm2254_vm5 = vmpackc.low %vm3895_vm13, %vm3895_vm13  ;;  %v2253_v54 = vpack.c.bf16 %v1106_v55, %v1105_v32  ;;  %2252 = vmatpush1.bf16.msk.msra.mxu0 %vm3849_vm8, %v2250_v5  ;;  %v2645_v12 = vpop.permute.xlu1 %2644 }
 0x133   :  { %v2256_v31 = vpack.c.bf16 %v1108_v57, %v1107_v10  ;;  %vm4273_vm0 = vmmov %vm4270_vm1  ;;  %v2647_v53 = vunpack.i.h.bf16 %v2645_v12  ;;  %v2646_v56 = vunpack.i.l.bf16 %v2645_v12 }
 0x134   :  { %2255 = vmatprep.subr.msk.bf16.mxu0 %vm2254_vm5, %v2253_v54  ;;  %v1104_v18 = vsel %vm4273_vm0, %v2627_v23, %v2632_v33  ;;  %vm4274_vm15 = vmmov %vm4273_vm0 }
 0x135   :  { %v1103_v19 = vsel %vm4274_vm15, %v2626_v25, %v2631_v8  ;;  %vm4276_vm10 = vmmov %vm4273_vm0 }
 0x136   :  { %v1117_v59 = vsel %vm4276_vm10, %v2631_v8, %v4275_v62  ;;  %vm4008_vm8 = vmand %vm3882_vm14, %vm303_vm4  ;;  %v2306_v52 = vpack.c.bf16 %v1104_v18, %v1103_v19  ;;  %2257 = vmatpush1.bf16.msra.mxu0 %v2256_v31  ;;  %vm4281_vm4 = vcmp.le.s32.totalorder %v3545_v27, 14 }
 0x137   :  { %vm4280_vm11 = vmmov %vm4273_vm0 }
 0x138   :  { %v1118_v1 = vsel %vm4280_vm11, %v2632_v33, %v4279_v63  ;;  %vm2304_vm9 = vmpackc.low %vm3882_vm14, %vm3882_vm14  ;;  %vm4295_vm11 = vcmask 130048  }
 0x139   :  { %v2303_v26 = vpack.c.bf16 %v1118_v1, %v1117_v59  ;;  %vm4023_vm2 = vmand %vm3895_vm13, %vm4281_vm4  ;;  %v4078_v16 = vpop.permute.xlu1 %1448 }
 0x13a   :  { %vm4286_vm14 = vmmov %vm4284_vm6  ;;  %v4075_v30 = vpop.permute.xlu0 %1443 }
 0x13b   :  { %v1221_v48 = vsel %vm4286_vm14, %v4285_v35, %v2637_v50  ;;  %vm4288_vm1 = vmmov %vm4284_vm6  ;;  %2305 = vmatprep.subr.msk.bf16.mxu1 %vm2304_vm9, %v2303_v26 }
 0x13c   :  { %v1230_v27 = vsel %vm4288_vm1, %v2646_v56, %v4287_v58  ;;  %vm4290_vm13 = vmmov %vm4288_vm1  ;;  %2307 = vmatpush1.bf16.msra.mxu1 %v2306_v52  ;;  %v2261_v21 = vpack.c.bf16 %v1221_v48, %v1220_v34 }
 0x13d   :  { %v1231_v51 = vsel %vm4290_vm13, %v2647_v53, %v4289_v15  ;;  %vm2309_vm7 = vmpackc.low %vm4008_vm8, %vm4008_vm8 }
 0x13e   :  { %v2308_v41 = vpack.c.bf16 %v1231_v51, %v1230_v27  ;;  %vm4291_vm5 = vmmov %vm4288_vm1 }
 0x13f   :  { %v1217_v7 = vsel %vm4291_vm5, %v2642_v2, %v2647_v53  ;;  %vm4292_vm0 = vmmov %vm4288_vm1  ;;  %v4086_v32 = vpop.permute.xlu1 %1453 }
 0x140   :  { %v1219_v29 = vsel %vm4292_vm0, %v2637_v50, %v2642_v2  ;;  %vm4293_vm15 = vmmov %vm4292_vm0  ;;  %2310 = vmatprep.subr.msk.bf16.mxu1 %vm2309_vm7, %v2308_v41  ;;  %v1798_v41 = vld [vmem:[#allocation7] sm:$0xff] }
 0x141   :  { %v1216_v24 = vsel %vm4293_vm15, %v2641_v40, %v2646_v56  ;;  %vm4294_vm10 = vmmov %vm4292_vm0 }
 0x142   :  { %v1218_v44 = vsel %vm4294_vm10, %v2636_v36, %v2641_v40  ;;  %v2311_v13 = vpack.c.bf16 %v1217_v7, %v1216_v24  ;;  %vm2259_vm8 = vmpackc.low %vm4023_vm2, %vm4023_vm2 }
 0x143   :  { %v2258_v60 = vpack.c.bf16 %v1219_v29, %v1218_v44  ;;  %vm4296_vm9 = vmmov %vm4295_vm11  ;;  %v1799_v29 = vld [vmem:[#allocation7 + $0x8] sm:$0xff]  ;;  %v1800_v44 = vld [vmem:[#allocation7 + $0x10] sm:$0xff] }
 0x144   :  { %2313 = vmatpush1.bf16.msk.msra.mxu1 %vm3922_vm12, %v2311_v13  ;;  %vm4297_vm4 = vmmov %vm4296_vm9 }
 0x145   :  { %2260 = vmatprep.subr.msk.bf16.mxu0 %vm2259_vm8, %v2258_v60  ;;  %v1801_v60 = vld [vmem:[#allocation7 + $0x18] sm:$0xff] }
 0x146   :  { %2263 = vmatpush1.bf16.msk.msra.mxu0 %vm3889_vm3, %v2261_v21  ;;  %vm4298_vm3 = vmmov %vm4297_vm4 }
 0x147   :  { %1780 = vmatmul.mubr.f32.vlgmr.msra.gmra.mrb[6].mxu1 %v3604_v9 }
 0x148   :  { %1984 = vmatprep.mubr.msk.f32.mxu1 %vm4296_vm9, %v3619_v39 }
 0x149   :  { %1697 = vmatmul.mubr.f32.vlgmr.msra.gmra.mrb[6].mxu0 %v3604_v9 }
 0x14a   :  { %1981 = vmatprep.mubr.msk.f32.mxu0 %vm4295_vm11, %v3619_v39 }
 0x14b   :  { %1786 = vmatmul.mubr.f32.gmra.mrb[8].mxu1 %v3657_v4 }
 0x14c   :  { %1985 = vmatprep.mubr.msk.f32.mxu1 %vm4298_vm3, %v3662_v42 }
 0x14d   :  { %1703 = vmatmul.mubr.f32.gmra.mrb[8].mxu0 %v3657_v4 }
 0x14e   :  { %1982 = vmatprep.mubr.msk.f32.mxu0 %vm4297_vm4, %v3662_v42 }
 0x14f   :  { %1792 = vmatmul.mubr.f32.gmra.mrb[10].mxu1 %v3696_v37 }
 0x151   :  { %1709 = vmatmul.mubr.f32.gmra.mrb[10].mxu0 %v3696_v37 }
 0x1d4   :  { %v1532_v9 = vpop.f32.mrb[0].mxu0 }
 0x1d5   :  { %v1534_v3 = vpop.f32.mrb[1].mxu0  ;;  %v1533_v39 = vadd.f32 %v1532_v9, %v4075_v30  ;;  %v1615_v38 = vpop.f32.mrb[0].mxu1 }
 0x1d6   :  { %v1535_v4 = vadd.f32 %v1534_v3, %v4075_v30  ;;  %v1617_v46 = vpop.f32.mrb[1].mxu1  ;;  %v1616_v61 = vadd.f32 %v1615_v38, %v4075_v30 }
 0x1d7   :  { %v1986_v20 = vmul.f32 -1.442695, %v1533_v39  ;;  %v1618_v23 = vadd.f32 %v1617_v46, %v4075_v30 }
 0x1d8   :  { %v1987_v25 = vmul.f32 -1.442695, %v1535_v4  ;;  %v1988_v22 = vmul.f32 -1.442695, %v1616_v61 }
 0x1d9   :  { %v1538_v42 = vpop.f32.mrb[2].mxu0  ;;  %2650 = vpow2.f32 %v1986_v20  ;;  %v1989_v45 = vmul.f32 -1.442695, %v1618_v23 }
 0x1da   :  { %v1539_v37 = vadd.f32 %v1538_v42, %v4078_v16  ;;  %v1540_v11 = vpop.f32.mrb[3].mxu0  ;;  %v1621_v49 = vpop.f32.mrb[2].mxu1  ;;  %2652 = vpow2.f32 %v1987_v25 }
 0x1db   :  { %v1541_v5 = vadd.f32 %v1540_v11, %v4078_v16  ;;  %v1622_v55 = vadd.f32 %v1621_v49, %v4078_v16  ;;  %2654 = vpow2.f32 %v1988_v22  ;;  %v1623_v57 = vpop.f32.mrb[3].mxu1 }
 0x1dc   :  { %v1994_v14 = vmul.f32 -1.442695, %v1539_v37  ;;  %2656 = vpow2.f32 %v1989_v45  ;;  %v1624_v10 = vadd.f32 %v1623_v57, %v4078_v16 }
 0x1dd   :  { %v1995_v6 = vmul.f32 -1.442695, %v1541_v5  ;;  %v1996_v54 = vmul.f32 -1.442695, %v1622_v55 }
 0x1de   :  { %2658 = vpow2.f32 %v1994_v14  ;;  %v1997_v0 = vmul.f32 -1.442695, %v1624_v10 }
 0x1df   :  { %v1544_v28 = vpop.f32.mrb[4].mxu0  ;;  %2660 = vpow2.f32 %v1995_v6 }
 0x1e0   :  { %v1546_v31 = vpop.f32.mrb[5].mxu0  ;;  %v1545_v8 = vadd.f32 %v1544_v28, %v4086_v32  ;;  %2662 = vpow2.f32 %v1996_v54 }
 0x1e1   :  { %v1627_v33 = vpop.f32.mrb[4].mxu1  ;;  %2664 = vpow2.f32 %v1997_v0  ;;  %v1547_v18 = vadd.f32 %v1546_v31, %v4086_v32 }
 0x1e2   :  { %v1628_v50 = vadd.f32 %v1627_v33, %v4086_v32  ;;  %v1629_v36 = vpop.f32.mrb[5].mxu1  ;;  %2666 = vtanh.f32 %v1545_v8 }
 0x1e3   :  { %v1630_v19 = vadd.f32 %v1629_v36, %v4086_v32  ;;  %v2651_v62 = vpop.eup %2650 }
 0x1e4   :  { %2668 = vtanh.f32 %v1628_v50  ;;  %v2653_v59 = vpop.eup %2652  ;;  %v1830_v12 = vadd.f32 1.0, %v2651_v62 }
 0x1e5   :  { %2670 = vtanh.f32 %v1547_v18  ;;  %v2655_v47 = vpop.eup %2654  ;;  %v1831_v63 = vadd.f32 1.0, %v2653_v59 }
 0x1e6   :  { %2672 = vtanh.f32 %v1630_v19  ;;  %v2657_v1 = vpop.eup %2656  ;;  %v1832_v52 = vadd.f32 1.0, %v2655_v47 }
 0x1e7   :  { %2674 = vrcp.f32 %v1830_v12  ;;  %v1833_v56 = vadd.f32 1.0, %v2657_v1 }
 0x1e8   :  { %v2659_v53 = vpop.eup %2658  ;;  %2676 = vrcp.f32 %v1831_v63 }
 0x1e9   :  { %v2661_v17 = vpop.eup %2660  ;;  %v1878_v26 = vadd.f32 1.0, %v2659_v53  ;;  %2678 = vrcp.f32 %v1832_v52 }
 0x1ea   :  { %v2663_v2 = vpop.eup %2662  ;;  %2680 = vrcp.f32 %v1833_v56  ;;  %v1879_v40 = vadd.f32 1.0, %v2661_v17 }
 0x1eb   :  { %v2665_v43 = vpop.eup %2664  ;;  %v1880_v34 = vadd.f32 1.0, %v2663_v2  ;;  %2682 = vrcp.f32 %v1878_v26 }
 0x1ec   :  { %2684 = vrcp.f32 %v1879_v40  ;;  %v1881_v35 = vadd.f32 1.0, %v2665_v43  ;;  %v2667_v48 = vpop.eup %2666 }
 0x1ed   :  { %2686 = vrcp.f32 %v1880_v34 }
 0x1ee   :  { %v2669_v58 = vpop.eup %2668  ;;  %2688 = vrcp.f32 %v1881_v35 }
 0x1ef   :  { %v2671_v27 = vpop.eup %2670 }
 0x1f0   :  { %v2673_v15 = vpop.eup %2672 }
 0x1f1   :  { %v2675_v51 = vpop.eup %2674 }
 0x1f2   :  { %v2677_v7 = vpop.eup %2676  ;;  %v1910_v21 = vmul.f32 %v2675_v51, %v1798_v41 }
 0x1f3   :  { %v2679_v24 = vpop.eup %2678  ;;  %v1911_v3 = vmul.f32 %v2677_v7, %v1799_v29 }
 0x1f4   :  { %v2681_v13 = vpop.eup %2680  ;;  %v1912_v4 = vmul.f32 %v2679_v24, %v1800_v44 }
 0x1f5   :  { %v2683_v9 = vpop.eup %2682  ;;  %v1913_v23 = vmul.f32 %v2681_v13, %v1801_v60 }
 0x1f6   :  { %v2685_v39 = vpop.eup %2684  ;;  %v1934_v38 = vmul.f32 %v2683_v9, %v2667_v48  ;;  %v1918_v46 = vsub.f32 1.0, %v2683_v9 }
 0x1f7   :  { %v2687_v61 = vpop.eup %2686  ;;  %v1919_v20 = vsub.f32 1.0, %v2685_v39  ;;  %v1935_v42 = vmul.f32 %v2685_v39, %v2671_v27 }
 0x1f8   :  { %v2689_v25 = vpop.eup %2688  ;;  %v1936_v37 = vmul.f32 %v2687_v61, %v2669_v58  ;;  %v1920_v22 = vsub.f32 1.0, %v2687_v61  ;;  %v1926_v11 = vmul.f32 %v1918_v46, %v1910_v21 }
 0x1f9   :  { %v1921_v49 = vsub.f32 1.0, %v2689_v25  ;;  %v1927_v45 = vmul.f32 %v1919_v20, %v1911_v3  ;;  %v1937_v5 = vmul.f32 %v2689_v25, %v2673_v15 }
 0x1fa   :  { %v1928_v55 = vmul.f32 %v1920_v22, %v1912_v4  ;;  %v1942_v14 = vadd.f32 %v1934_v38, %v1926_v11 }
 0x1fb   :  { %v1943_v57 = vadd.f32 %v1935_v42, %v1927_v45  ;;  %v1929_v6 = vmul.f32 %v1921_v49, %v1913_v23  ;;  %v1802_v49 = vld [vmem:[#allocation7 + $0x20] sm:$0xff] }
 0x1fc   :  { %v1944_v10 = vadd.f32 %v1936_v37, %v1928_v55  ;;  %1950 = vst [vmem:[#allocation10] sm:$0xff] %v1942_v14  ;;  %v1803_v14 = vld [vmem:[#allocation7 + $0x28] sm:$0xff] }
 0x1fd   :  { %1951 = vst [vmem:[#allocation10 + $0x8] sm:$0xff] %v1943_v57  ;;  %v1945_v28 = vadd.f32 %v1937_v5, %v1929_v6  ;;  %v1804_v5 = vld [vmem:[#allocation7 + $0x30] sm:$0xff] }
 0x1fe   :  { %1952 = vst [vmem:[#allocation10 + $0x10] sm:$0xff] %v1944_v10  ;;  %v1805_v10 = vld [vmem:[#allocation7 + $0x38] sm:$0xff] }
 0x1ff   :  { %1953 = vst [vmem:[#allocation10 + $0x18] sm:$0xff] %v1945_v28 }
 0x21a   :  { %v1781_v31 = vpop.f32.mrb[6].mxu1 }
 0x21b   :  { %v1782_v33 = vadd.f32 %v1781_v31, %v4075_v30  ;;  %v1783_v50 = vpop.f32.mrb[7].mxu1 }
 0x21c   :  { %v1698_v54 = vpop.f32.mrb[6].mxu0  ;;  %v1784_v18 = vadd.f32 %v1783_v50, %v4075_v30 }
 0x21d   :  { %v1699_v0 = vadd.f32 %v1698_v54, %v4075_v30  ;;  %v1700_v8 = vpop.f32.mrb[7].mxu0  ;;  %v1992_v62 = vmul.f32 -1.442695, %v1782_v33 }
 0x21e   :  { %v1701_v36 = vadd.f32 %v1700_v8, %v4075_v30  ;;  %v1993_v12 = vmul.f32 -1.442695, %v1784_v18  ;;  %v1787_v63 = vpop.f32.mrb[8].mxu1 }
 0x21f   :  { %v1990_v19 = vmul.f32 -1.442695, %v1699_v0  ;;  %v1788_v52 = vadd.f32 %v1787_v63, %v4078_v16  ;;  %v1789_v56 = vpop.f32.mrb[9].mxu1 }
 0x220   :  { %v1991_v59 = vmul.f32 -1.442695, %v1701_v36  ;;  %v1704_v47 = vpop.f32.mrb[8].mxu0  ;;  %v1790_v26 = vadd.f32 %v1789_v56, %v4078_v16 }
 0x221   :  { %2690 = vpow2.f32 %v1990_v19  ;;  %v1705_v1 = vadd.f32 %v1704_v47, %v4078_v16  ;;  %v1706_v53 = vpop.f32.mrb[9].mxu0  ;;  %v2000_v2 = vmul.f32 -1.442695, %v1788_v52 }
 0x222   :  { %2692 = vpow2.f32 %v1992_v62  ;;  %v1707_v17 = vadd.f32 %v1706_v53, %v4078_v16  ;;  %v2001_v43 = vmul.f32 -1.442695, %v1790_v26  ;;  %v1793_v35 = vpop.f32.mrb[10].mxu1 }
 0x223   :  { %2694 = vpow2.f32 %v1991_v59  ;;  %v1998_v30 = vmul.f32 -1.442695, %v1705_v1  ;;  %v1795_v58 = vpop.f32.mrb[11].mxu1  ;;  %v1794_v15 = vadd.f32 %v1793_v35, %v4086_v32 }
 0x224   :  { %2696 = vpow2.f32 %v1993_v12  ;;  %v1999_v40 = vmul.f32 -1.442695, %v1707_v17  ;;  %v1710_v34 = vpop.f32.mrb[10].mxu0  ;;  %v1796_v51 = vadd.f32 %v1795_v58, %v4086_v32 }
 0x225   :  { %2698 = vpow2.f32 %v1998_v30  ;;  %v1712_v48 = vpop.f32.mrb[11].mxu0  ;;  %v1711_v27 = vadd.f32 %v1710_v34, %v4086_v32 }
 0x226   :  { %2700 = vpow2.f32 %v2000_v2  ;;  %v1713_v16 = vadd.f32 %v1712_v48, %v4086_v32 }
 0x227   :  { %2702 = vpow2.f32 %v1999_v40 }
 0x228   :  { %2704 = vpow2.f32 %v2001_v43 }
 0x229   :  { %2706 = vtanh.f32 %v1711_v27 }
 0x22a   :  { %2708 = vtanh.f32 %v1794_v15 }
 0x22b   :  { %v2691_v41 = vpop.eup %2690  ;;  %2710 = vtanh.f32 %v1713_v16 }
 0x22c   :  { %v2693_v7 = vpop.eup %2692  ;;  %v1834_v29 = vadd.f32 1.0, %v2691_v41  ;;  %2712 = vtanh.f32 %v1796_v51 }
 0x22d   :  { %v2695_v24 = vpop.eup %2694  ;;  %v1836_v44 = vadd.f32 1.0, %v2693_v7 }
 0x22e   :  { %v2697_v13 = vpop.eup %2696  ;;  %2714 = vrcp.f32 %v1834_v29  ;;  %v1835_v60 = vadd.f32 1.0, %v2695_v24 }
 0x22f   :  { %v2699_v21 = vpop.eup %2698  ;;  %2716 = vrcp.f32 %v1836_v44  ;;  %v1837_v9 = vadd.f32 1.0, %v2697_v13 }
 0x230   :  { %v2701_v3 = vpop.eup %2700  ;;  %2718 = vrcp.f32 %v1835_v60  ;;  %v1882_v39 = vadd.f32 1.0, %v2699_v21 }
 0x231   :  { %v2703_v38 = vpop.eup %2702  ;;  %2720 = vrcp.f32 %v1837_v9  ;;  %v1884_v32 = vadd.f32 1.0, %v2701_v3 }
 0x232   :  { %v2705_v4 = vpop.eup %2704  ;;  %2722 = vrcp.f32 %v1882_v39  ;;  %v1883_v46 = vadd.f32 1.0, %v2703_v38 }
 0x233   :  { %2724 = vrcp.f32 %v1884_v32  ;;  %v1885_v61 = vadd.f32 1.0, %v2705_v4  ;;  %v2707_v20 = vpop.eup %2706 }
 0x234   :  { %2726 = vrcp.f32 %v1883_v46  ;;  %v2709_v42 = vpop.eup %2708 }
 0x235   :  { %2728 = vrcp.f32 %v1885_v61  ;;  %v2711_v23 = vpop.eup %2710 }
 0x236   :  { %v2713_v25 = vpop.eup %2712 }
 0x238   :  { %v2715_v37 = vpop.eup %2714 }
 0x239   :  { %v2717_v22 = vpop.eup %2716  ;;  %v1914_v6 = vmul.f32 %v2715_v37, %v1802_v49 }
 0x23a   :  { %v2719_v11 = vpop.eup %2718  ;;  %v1916_v0 = vmul.f32 %v2717_v22, %v1804_v5 }
 0x23b   :  { %v2721_v45 = vpop.eup %2720  ;;  %v1915_v36 = vmul.f32 %v2719_v11, %v1803_v14 }
 0x23c   :  { %v2723_v55 = vpop.eup %2722  ;;  %v1917_v59 = vmul.f32 %v2721_v45, %v1805_v10 }
 0x23d   :  { %v2725_v57 = vpop.eup %2724  ;;  %v1922_v28 = vsub.f32 1.0, %v2723_v55  ;;  %v1938_v54 = vmul.f32 %v2723_v55, %v2707_v20 }
 0x23e   :  { %v2727_v31 = vpop.eup %2726  ;;  %v1924_v33 = vsub.f32 1.0, %v2725_v57  ;;  %v1940_v8 = vmul.f32 %v2725_v57, %v2709_v42 }
 0x23f   :  { %v2729_v50 = vpop.eup %2728  ;;  %v1923_v18 = vsub.f32 1.0, %v2727_v31  ;;  %v1930_v19 = vmul.f32 %v1922_v28, %v1914_v6  ;;  %v1939_v62 = vmul.f32 %v2727_v31, %v2711_v23 }
 0x240   :  { %v1925_v12 = vsub.f32 1.0, %v2729_v50  ;;  %v1932_v47 = vmul.f32 %v1924_v33, %v1916_v0  ;;  %v1941_v63 = vmul.f32 %v2729_v50, %v2713_v25 }
 0x241   :  { %v1946_v1 = vadd.f32 %v1938_v54, %v1930_v19  ;;  %v1931_v52 = vmul.f32 %v1923_v18, %v1915_v36 }
 0x242   :  { %v1948_v53 = vadd.f32 %v1940_v8, %v1932_v47  ;;  %v1933_v56 = vmul.f32 %v1925_v12, %v1917_v59 }
 0x243   :  { %1954 = vst [vmem:[#allocation10 + $0x20] sm:$0xff] %v1946_v1  ;;  %v1947_v17 = vadd.f32 %v1939_v62, %v1931_v52 }
 0x244   :  { %1956 = vst [vmem:[#allocation10 + $0x30] sm:$0xff] %v1948_v53  ;;  %v1949_v26 = vadd.f32 %v1941_v63, %v1933_v56 }
 0x245   :  { %1955 = vst [vmem:[#allocation10 + $0x28] sm:$0xff] %v1947_v17 }
 0x246   :  { %1957 = vst [vmem:[#allocation10 + $0x38] sm:$0xff] %v1949_v26 }
 0x247   :  { %2815 = shalt.err (!%p2812_p0)
}
 0x248   :  { %s2816_s14 = scalar_lea.hbm %s4121_s4, 1024 }
 0x249   :  { %p2817_p1 = scmp.ne.s32.totalorder %s4121_s4, %s2816_s14  ;;  %p2820_p2 = scmp.lt.u32.totalorder %s2816_s14, %s4121_s4 }
 0x24b   :  { %p2822_p3 = pnand %p2820_p2, %p2817_p1 }
 0x24d   :  { %2825 = shalt.err (!%p2822_p3)
}
 0x24e   :  { %1967 = dma.vmem_to_hbm [thread:$0]  %s1965_s1, 1024, %s4121_s4, [#allocation6]  }
 0x24f   :  { %2830 = dma.done.wait [#allocation6], 1024  }
 0x250   :  { %2831 = vsyncadd [#allocation6], 4294966272 }
 0x251   :  { %1971 = vsyncpa [#allocation5], 1 }
 0x252   :  { %1972 = vsyncpa [#allocation8], 1 }
 0x253   :  { %1973 = vsyncpa [#allocation6], 1 }

</bundles_post_ra>
